<compile_context>
chip_gen: v7x
topology: tpu7x:2x2x1
jax: 0.10.0
libtpu: 0.0.40
codegen_flags: <defaults>
</compile_context>

<pallas_src>
import functools
import math

import jax
import jax.numpy as jnp
from jax.experimental import pallas as pl
from jax.experimental.pallas import tpu as pltpu


def _conv2d_taps_kernel(x_ref, w_ref, o_ref, *, KH, KW, C_pad, OW,
                        rows_per_tile, stride):
    """One grid step = one (image, O-tile, M-tile).

    x_ref: (Hp_pad, Wp, C_pad)       padded NHWC image, bf16 (batch dim squeezed)
    w_ref: (KH*KW*C_pad, TILE_O)     weight rows ordered (kh, kw, c), bf16
    o_ref: (TILE_M, TILE_O)          channels-last output tile, f32
    """
    m_idx = pl.program_id(2)                   # M-tile axis is always innermost
    r0 = m_idx * rows_per_tile                 # first output row of this tile
    tile_m = rows_per_tile * OW

    acc = None
    for kh in range(KH):
        for kw in range(KW):
            h0 = r0 * stride + kh
            if stride == 1:
                sl = x_ref[pl.ds(h0, rows_per_tile), kw:kw + OW, :]
            else:
                # TODO(synk): strided sublane reads on the W axis; verified
                # only for stride == 1 (the module default / test case).
                sl = x_ref[pl.ds(h0, rows_per_tile, stride),
                           pl.ds(kw, OW, stride), :]
            patch = sl.reshape(tile_m, C_pad)                  # (TILE_M, C_pad) bf16
            tap = kh * KW + kw
            w_tap = w_ref[tap * C_pad:(tap + 1) * C_pad, :]    # (C_pad, TILE_O) bf16
            d = jnp.dot(patch, w_tap, preferred_element_type=jnp.float32)
            acc = d if acc is None else acc + d
    o_ref[...] = acc


def conv2d_pallas(x, weight, stride=1, padding=0):
    """Conv2d forward, bias=False (same semantics as F.conv2d; bf16 MXU inputs,
    f32 accumulation).

    x:      (N, C, H, W)    float32 NCHW
    weight: (O, C, KH, KW)  float32 OIHW
    returns (N, O, OH, OW)  float32
    """
    N, C, H, W = x.shape
    O, C2, KH, KW = weight.shape
    assert C == C2

    OH = (H + 2 * padding - KH) // stride + 1
    OW = (W + 2 * padding - KW) // stride + 1
    assert OH > 0 and OW > 0

    # ---------------- tiling ----------------
    C_pad = ((C + 7) // 8) * 8                 # sublane-aligned weight tap rows
    O_pad = ((O + 127) // 128) * 128           # lane-dense output channels
    TILE_O = 256 if O_pad % 256 == 0 else 128
    n_o = O_pad // TILE_O
    Kdim = KH * KW * C_pad

    # M-tile: whole output rows, TILE_M = rows_per_tile*OW multiple of 8,
    # targeting ~512 patch rows per matmul (fits v7x's smaller VMEM too).
    rows_unit = 8 // math.gcd(OW, 8)
    target_rows = max(1, 512 // OW)
    rows_per_tile = max(rows_unit, (target_rows // rows_unit) * rows_unit)
    oh_ceil = -(-OH // rows_unit) * rows_unit
    rows_per_tile = min(rows_per_tile, oh_ceil)
    n_m = -(-OH // rows_per_tile)
    OH_pad = n_m * rows_per_tile
    TILE_M = rows_per_tile * OW
    M = OH * OW
    M_pad = OH_pad * OW

    # ---------------- wrapper-side layout glue (fuses under jit) ----------------
    Hp = H + 2 * padding
    Wp = W + 2 * padding
    Hp_use = max(Hp, (OH_pad - 1) * stride + KH)   # keep last M tile in-bounds
    extra_h = Hp_use - Hp

    x_nhwc = jnp.transpose(x.astype(jnp.bfloat16), (0, 2, 3, 1))
    x_nhwc = jnp.pad(
        x_nhwc,
        ((0, 0), (padding, padding + extra_h), (padding, padding), (0, C_pad - C)))

    w_pad = jnp.pad(weight.astype(jnp.bfloat16),
                    ((0, O_pad - O), (0, C_pad - C), (0, 0), (0, 0)))
    w_mat = jnp.transpose(w_pad, (2, 3, 1, 0)).reshape(Kdim, O_pad)   # rows (kh,kw,c)

    # ---------------- VMEM budget ----------------
    in_block = Hp_use * Wp * C_pad * 2
    w_block = Kdim * TILE_O * 2
    out_block = TILE_M * TILE_O * 4
    working = TILE_M * TILE_O * 4 + 4 * TILE_M * C_pad * 2
    vmem_needed = 2 * in_block + 2 * w_block + 2 * out_block + working
    vmem_limit = int(min(max(2 * vmem_needed, 16 << 20), 64 << 20))

    # ---------------- shape-dependent grid-axis order ----------------
    w_total = Kdim * O_pad * 2
    extra_batch_outer = (N - 1) * w_total if n_o > 1 else 0      # weight re-fetch cost
    extra_otile_outer = (n_o - 1) * N * in_block if N > 1 else 0  # image re-fetch cost
    batch_outer = extra_batch_outer <= extra_otile_outer

    if batch_outer:
        grid = (N, n_o, n_m)
        x_idx = lambda n, j, m: (n, 0, 0, 0)
        w_idx = lambda n, j, m: (0, j)
        o_idx = lambda n, j, m: (n, m, j)
        x_traffic = N * in_block
        w_traffic = (N if n_o > 1 else 1) * w_total
    else:
        grid = (n_o, N, n_m)
        x_idx = lambda j, n, m: (n, 0, 0, 0)
        w_idx = lambda j, n, m: (0, j)
        o_idx = lambda j, n, m: (n, m, j)
        x_traffic = (n_o if N > 1 else 1) * N * in_block
        w_traffic = w_total

    cost = pl.CostEstimate(
        flops=int(2 * N * M * (KH * KW * C) * O),
        transcendentals=0,
        bytes_accessed=int(x_traffic + w_traffic + N * M_pad * O_pad * 4),
    )

    kernel = functools.partial(
        _conv2d_taps_kernel,
        KH=KH, KW=KW, C_pad=C_pad, OW=OW,
        rows_per_tile=rows_per_tile, stride=stride)

    out = pl.pallas_call(
        kernel,
        out_shape=jax.ShapeDtypeStruct((N, M_pad, O_pad), jnp.float32),
        grid_spec=pltpu.PrefetchScalarGridSpec(
            num_scalar_prefetch=0,
            grid=grid,
            in_specs=[
                # Whole padded image (full last-3 dims -> (8,128) rule holds for
                # any Wp/C). Index constant over inner axes -> fetched once.
                pl.BlockSpec((None, Hp_use, Wp, C_pad), x_idx),
                pl.BlockSpec((Kdim, TILE_O), w_idx),
            ],
            out_specs=pl.BlockSpec((None, TILE_M, TILE_O), o_idx),
        ),
        compiler_params=pltpu.CompilerParams(
            dimension_semantics=("parallel", "parallel", "parallel"),
            vmem_limit_bytes=vmem_limit,
        ),
        cost_estimate=cost,
    )(x_nhwc, w_mat)

    # Strip padding; return NCHW (module contract).
    out = out[:, :M, :O].reshape(N, OH, OW, O)
    return jnp.transpose(out, (0, 3, 1, 2))


def init_conv2d_weight(key, in_channels, out_channels, kernel_size):
    """Replicates the module __init__ exactly (note the module uses
    (6/(fan_in+fan_out)) ** (-0.5), i.e. the reciprocal of textbook Xavier)."""
    fan_in = in_channels * kernel_size * kernel_size
    fan_out = out_channels * kernel_size * kernel_size
    scale = (6.0 / (fan_in + fan_out)) ** (-0.5)
    shape = (out_channels, in_channels, kernel_size, kernel_size)
    return jax.random.uniform(key, shape, jnp.float32, minval=-scale, maxval=scale)


if __name__ == "__main__":
    key = jax.random.PRNGKey(0)
    k_x, k_w = jax.random.split(key)

    # Small shapes consistent with the module's forward (NCHW input).
    N, C, H, W = 2, 4, 16, 16
    out_channels, kernel_size, stride, padding = 8, 3, 1, 1

    x = jax.random.normal(k_x, (N, C, H, W), jnp.float32)
    weight = init_conv2d_weight(k_w, C, out_channels, kernel_size)

    conv = jax.jit(functools.partial(conv2d_pallas, stride=stride, padding=padding))
    y = jax.block_until_ready(conv(x, weight))

    # Correctness check vs XLA conv at matching (bf16-rounded) input precision:
    # bf16*bf16 products are exact in f32, so remaining diff is accumulation order.
    x_bf = x.astype(jnp.bfloat16).astype(jnp.float32)
    w_bf = weight.astype(jnp.bfloat16).astype(jnp.float32)
    ref = jax.lax.conv_general_dilated(
        x_bf, w_bf,
        window_strides=(stride, stride),
        padding=[(padding, padding), (padding, padding)],
        dimension_numbers=("NCHW", "OIHW", "NCHW"),
    )
    assert y.shape == ref.shape, (y.shape, ref.shape)
    max_err = float(jnp.max(jnp.abs(y - ref)))
    assert jnp.allclose(y, ref, atol=1e-2, rtol=1e-2), max_err

    print("KERNEL_OK")
</pallas_src>

<mosaic_0001>
module attributes {stable_mosaic.version = 11 : i64} {
  func.func @_conv2d_taps_kernel(%arg0: i32, %arg1: i32, %arg2: i32, %arg3: memref<1x18x18x8xbf16, #tpu.memory_space<vmem>>, %arg4: memref<72x128xbf16, #tpu.memory_space<vmem>>, %arg5: memref<1x256x128xf32, #tpu.memory_space<vmem>>) attributes {dimension_semantics = [#tpu.dimension_semantics<parallel>, #tpu.dimension_semantics<parallel>, #tpu.dimension_semantics<parallel>], iteration_bounds = array<i64: 2, 1, 1>, scalar_prefetch = 0 : i64, scratch_operands = 0 : i64, tpu.core_type = #tpu.core_type<tc>, window_params = [{transform_indices = @transform_0, window_bounds = array<i64: 1, 18, 18, 8>}, {transform_indices = @transform_1, window_bounds = array<i64: 72, 128>}, {transform_indices = @transform_2, window_bounds = array<i64: 1, 256, 128>}]} {
    %c16_i32 = arith.constant 16 : i32
    %0 = arith.muli %arg2, %c16_i32 : i32
    %c1_i32 = arith.constant 1 : i32
    %1 = arith.muli %0, %c1_i32 : i32
    %c0_i32 = arith.constant 0 : i32
    %2 = arith.addi %1, %c0_i32 : i32
    %c0 = arith.constant 0 : index
    %3 = arith.index_cast %2 : i32 to index
    %c0_0 = arith.constant 0 : index
    %c0_1 = arith.constant 0 : index
    %4 = vector.load %arg3[%c0, %3, %c0_0, %c0_1] : memref<1x18x18x8xbf16, #tpu.memory_space<vmem>>, vector<1x16x16x8xbf16>
    %5 = vector.shape_cast %4 : vector<1x16x16x8xbf16> to vector<16x16x8xbf16>
    %6 = vector.shape_cast %5 : vector<16x16x8xbf16> to vector<256x8xbf16>
    %c0_2 = arith.constant 0 : index
    %c0_3 = arith.constant 0 : index
    %7 = vector.load %arg4[%c0_2, %c0_3] : memref<72x128xbf16, #tpu.memory_space<vmem>>, vector<8x128xbf16>
    %cst = arith.constant dense<0.000000e+00> : vector<256x128xf32>
    %8 = tpu.matmul %6, %7, %cst {dimension_numbers = #tpu.dot_dimension_numbers<[1], [0], [0], [1], [0, 0, 1, 1], [], []>} : vector<256x8xbf16>, vector<8x128xbf16>, vector<256x128xf32> -> vector<256x128xf32>
    %c1_i32_4 = arith.constant 1 : i32
    %9 = arith.muli %0, %c1_i32_4 : i32
    %c0_i32_5 = arith.constant 0 : i32
    %10 = arith.addi %9, %c0_i32_5 : i32
    %c0_6 = arith.constant 0 : index
    %11 = arith.index_cast %10 : i32 to index
    %c1 = arith.constant 1 : index
    %c0_7 = arith.constant 0 : index
    %12 = vector.load %arg3[%c0_6, %11, %c1, %c0_7] : memref<1x18x18x8xbf16, #tpu.memory_space<vmem>>, vector<1x16x16x8xbf16>
    %13 = vector.shape_cast %12 : vector<1x16x16x8xbf16> to vector<16x16x8xbf16>
    %14 = vector.shape_cast %13 : vector<16x16x8xbf16> to vector<256x8xbf16>
    %c8 = arith.constant 8 : index
    %c0_8 = arith.constant 0 : index
    %15 = vector.load %arg4[%c8, %c0_8] : memref<72x128xbf16, #tpu.memory_space<vmem>>, vector<8x128xbf16>
    %cst_9 = arith.constant dense<0.000000e+00> : vector<256x128xf32>
    %16 = tpu.matmul %14, %15, %cst_9 {dimension_numbers = #tpu.dot_dimension_numbers<[1], [0], [0], [1], [0, 0, 1, 1], [], []>} : vector<256x8xbf16>, vector<8x128xbf16>, vector<256x128xf32> -> vector<256x128xf32>
    %17 = arith.addf %8, %16 : vector<256x128xf32>
    %c1_i32_10 = arith.constant 1 : i32
    %18 = arith.muli %0, %c1_i32_10 : i32
    %c0_i32_11 = arith.constant 0 : i32
    %19 = arith.addi %18, %c0_i32_11 : i32
    %c0_12 = arith.constant 0 : index
    %20 = arith.index_cast %19 : i32 to index
    %c2 = arith.constant 2 : index
    %c0_13 = arith.constant 0 : index
    %21 = vector.load %arg3[%c0_12, %20, %c2, %c0_13] : memref<1x18x18x8xbf16, #tpu.memory_space<vmem>>, vector<1x16x16x8xbf16>
    %22 = vector.shape_cast %21 : vector<1x16x16x8xbf16> to vector<16x16x8xbf16>
    %23 = vector.shape_cast %22 : vector<16x16x8xbf16> to vector<256x8xbf16>
    %c16 = arith.constant 16 : index
    %c0_14 = arith.constant 0 : index
    %24 = vector.load %arg4[%c16, %c0_14] : memref<72x128xbf16, #tpu.memory_space<vmem>>, vector<8x128xbf16>
    %cst_15 = arith.constant dense<0.000000e+00> : vector<256x128xf32>
    %25 = tpu.matmul %23, %24, %cst_15 {dimension_numbers = #tpu.dot_dimension_numbers<[1], [0], [0], [1], [0, 0, 1, 1], [], []>} : vector<256x8xbf16>, vector<8x128xbf16>, vector<256x128xf32> -> vector<256x128xf32>
    %26 = arith.addf %17, %25 : vector<256x128xf32>
    %c1_i32_16 = arith.constant 1 : i32
    %27 = arith.muli %0, %c1_i32_16 : i32
    %c1_i32_17 = arith.constant 1 : i32
    %28 = arith.addi %27, %c1_i32_17 : i32
    %c0_18 = arith.constant 0 : index
    %29 = arith.index_cast %28 : i32 to index
    %c0_19 = arith.constant 0 : index
    %c0_20 = arith.constant 0 : index
    %30 = vector.load %arg3[%c0_18, %29, %c0_19, %c0_20] : memref<1x18x18x8xbf16, #tpu.memory_space<vmem>>, vector<1x16x16x8xbf16>
    %31 = vector.shape_cast %30 : vector<1x16x16x8xbf16> to vector<16x16x8xbf16>
    %32 = vector.shape_cast %31 : vector<16x16x8xbf16> to vector<256x8xbf16>
    %c24 = arith.constant 24 : index
    %c0_21 = arith.constant 0 : index
    %33 = vector.load %arg4[%c24, %c0_21] : memref<72x128xbf16, #tpu.memory_space<vmem>>, vector<8x128xbf16>
    %cst_22 = arith.constant dense<0.000000e+00> : vector<256x128xf32>
    %34 = tpu.matmul %32, %33, %cst_22 {dimension_numbers = #tpu.dot_dimension_numbers<[1], [0], [0], [1], [0, 0, 1, 1], [], []>} : vector<256x8xbf16>, vector<8x128xbf16>, vector<256x128xf32> -> vector<256x128xf32>
    %35 = arith.addf %26, %34 : vector<256x128xf32>
    %c1_i32_23 = arith.constant 1 : i32
    %36 = arith.muli %0, %c1_i32_23 : i32
    %c1_i32_24 = arith.constant 1 : i32
    %37 = arith.addi %36, %c1_i32_24 : i32
    %c0_25 = arith.constant 0 : index
    %38 = arith.index_cast %37 : i32 to index
    %c1_26 = arith.constant 1 : index
    %c0_27 = arith.constant 0 : index
    %39 = vector.load %arg3[%c0_25, %38, %c1_26, %c0_27] : memref<1x18x18x8xbf16, #tpu.memory_space<vmem>>, vector<1x16x16x8xbf16>
    %40 = vector.shape_cast %39 : vector<1x16x16x8xbf16> to vector<16x16x8xbf16>
    %41 = vector.shape_cast %40 : vector<16x16x8xbf16> to vector<256x8xbf16>
    %c32 = arith.constant 32 : index
    %c0_28 = arith.constant 0 : index
    %42 = vector.load %arg4[%c32, %c0_28] : memref<72x128xbf16, #tpu.memory_space<vmem>>, vector<8x128xbf16>
    %cst_29 = arith.constant dense<0.000000e+00> : vector<256x128xf32>
    %43 = tpu.matmul %41, %42, %cst_29 {dimension_numbers = #tpu.dot_dimension_numbers<[1], [0], [0], [1], [0, 0, 1, 1], [], []>} : vector<256x8xbf16>, vector<8x128xbf16>, vector<256x128xf32> -> vector<256x128xf32>
    %44 = arith.addf %35, %43 : vector<256x128xf32>
    %c1_i32_30 = arith.constant 1 : i32
    %45 = arith.muli %0, %c1_i32_30 : i32
    %c1_i32_31 = arith.constant 1 : i32
    %46 = arith.addi %45, %c1_i32_31 : i32
    %c0_32 = arith.constant 0 : index
    %47 = arith.index_cast %46 : i32 to index
    %c2_33 = arith.constant 2 : index
    %c0_34 = arith.constant 0 : index
    %48 = vector.load %arg3[%c0_32, %47, %c2_33, %c0_34] : memref<1x18x18x8xbf16, #tpu.memory_space<vmem>>, vector<1x16x16x8xbf16>
    %49 = vector.shape_cast %48 : vector<1x16x16x8xbf16> to vector<16x16x8xbf16>
    %50 = vector.shape_cast %49 : vector<16x16x8xbf16> to vector<256x8xbf16>
    %c40 = arith.constant 40 : index
    %c0_35 = arith.constant 0 : index
    %51 = vector.load %arg4[%c40, %c0_35] : memref<72x128xbf16, #tpu.memory_space<vmem>>, vector<8x128xbf16>
    %cst_36 = arith.constant dense<0.000000e+00> : vector<256x128xf32>
    %52 = tpu.matmul %50, %51, %cst_36 {dimension_numbers = #tpu.dot_dimension_numbers<[1], [0], [0], [1], [0, 0, 1, 1], [], []>} : vector<256x8xbf16>, vector<8x128xbf16>, vector<256x128xf32> -> vector<256x128xf32>
    %53 = arith.addf %44, %52 : vector<256x128xf32>
    %c1_i32_37 = arith.constant 1 : i32
    %54 = arith.muli %0, %c1_i32_37 : i32
    %c2_i32 = arith.constant 2 : i32
    %55 = arith.addi %54, %c2_i32 : i32
    %c0_38 = arith.constant 0 : index
    %56 = arith.index_cast %55 : i32 to index
    %c0_39 = arith.constant 0 : index
    %c0_40 = arith.constant 0 : index
    %57 = vector.load %arg3[%c0_38, %56, %c0_39, %c0_40] : memref<1x18x18x8xbf16, #tpu.memory_space<vmem>>, vector<1x16x16x8xbf16>
    %58 = vector.shape_cast %57 : vector<1x16x16x8xbf16> to vector<16x16x8xbf16>
    %59 = vector.shape_cast %58 : vector<16x16x8xbf16> to vector<256x8xbf16>
    %c48 = arith.constant 48 : index
    %c0_41 = arith.constant 0 : index
    %60 = vector.load %arg4[%c48, %c0_41] : memref<72x128xbf16, #tpu.memory_space<vmem>>, vector<8x128xbf16>
    %cst_42 = arith.constant dense<0.000000e+00> : vector<256x128xf32>
    %61 = tpu.matmul %59, %60, %cst_42 {dimension_numbers = #tpu.dot_dimension_numbers<[1], [0], [0], [1], [0, 0, 1, 1], [], []>} : vector<256x8xbf16>, vector<8x128xbf16>, vector<256x128xf32> -> vector<256x128xf32>
    %62 = arith.addf %53, %61 : vector<256x128xf32>
    %c1_i32_43 = arith.constant 1 : i32
    %63 = arith.muli %0, %c1_i32_43 : i32
    %c2_i32_44 = arith.constant 2 : i32
    %64 = arith.addi %63, %c2_i32_44 : i32
    %c0_45 = arith.constant 0 : index
    %65 = arith.index_cast %64 : i32 to index
    %c1_46 = arith.constant 1 : index
    %c0_47 = arith.constant 0 : index
    %66 = vector.load %arg3[%c0_45, %65, %c1_46, %c0_47] : memref<1x18x18x8xbf16, #tpu.memory_space<vmem>>, vector<1x16x16x8xbf16>
    %67 = vector.shape_cast %66 : vector<1x16x16x8xbf16> to vector<16x16x8xbf16>
    %68 = vector.shape_cast %67 : vector<16x16x8xbf16> to vector<256x8xbf16>
    %c56 = arith.constant 56 : index
    %c0_48 = arith.constant 0 : index
    %69 = vector.load %arg4[%c56, %c0_48] : memref<72x128xbf16, #tpu.memory_space<vmem>>, vector<8x128xbf16>
    %cst_49 = arith.constant dense<0.000000e+00> : vector<256x128xf32>
    %70 = tpu.matmul %68, %69, %cst_49 {dimension_numbers = #tpu.dot_dimension_numbers<[1], [0], [0], [1], [0, 0, 1, 1], [], []>} : vector<256x8xbf16>, vector<8x128xbf16>, vector<256x128xf32> -> vector<256x128xf32>
    %71 = arith.addf %62, %70 : vector<256x128xf32>
    %c1_i32_50 = arith.constant 1 : i32
    %72 = arith.muli %0, %c1_i32_50 : i32
    %c2_i32_51 = arith.constant 2 : i32
    %73 = arith.addi %72, %c2_i32_51 : i32
    %c0_52 = arith.constant 0 : index
    %74 = arith.index_cast %73 : i32 to index
    %c2_53 = arith.constant 2 : index
    %c0_54 = arith.constant 0 : index
    %75 = vector.load %arg3[%c0_52, %74, %c2_53, %c0_54] : memref<1x18x18x8xbf16, #tpu.memory_space<vmem>>, vector<1x16x16x8xbf16>
    %76 = vector.shape_cast %75 : vector<1x16x16x8xbf16> to vector<16x16x8xbf16>
    %77 = vector.shape_cast %76 : vector<16x16x8xbf16> to vector<256x8xbf16>
    %c64 = arith.constant 64 : index
    %c0_55 = arith.constant 0 : index
    %78 = vector.load %arg4[%c64, %c0_55] : memref<72x128xbf16, #tpu.memory_space<vmem>>, vector<8x128xbf16>
    %cst_56 = arith.constant dense<0.000000e+00> : vector<256x128xf32>
    %79 = tpu.matmul %77, %78, %cst_56 {dimension_numbers = #tpu.dot_dimension_numbers<[1], [0], [0], [1], [0, 0, 1, 1], [], []>} : vector<256x8xbf16>, vector<8x128xbf16>, vector<256x128xf32> -> vector<256x128xf32>
    %80 = arith.addf %71, %79 : vector<256x128xf32>
    %c0_57 = arith.constant 0 : index
    %c0_58 = arith.constant 0 : index
    %c0_59 = arith.constant 0 : index
    %81 = vector.load %arg5[%c0_57, %c0_58, %c0_59] : memref<1x256x128xf32, #tpu.memory_space<vmem>>, vector<1x256x128xf32>
    %82 = vector.shape_cast %81 : vector<1x256x128xf32> to vector<256x128xf32>
    %83 = vector.shape_cast %80 : vector<256x128xf32> to vector<1x256x128xf32>
    tpu.vector_store %arg5[%c0_57, %c0_58, %c0_59], %83 {strides = array<i32>} : memref<1x256x128xf32, #tpu.memory_space<vmem>>, vector<1x256x128xf32>,
    return
  }
  func.func @transform_0(%arg0: i32, %arg1: i32, %arg2: i32) -> (i32, i32, i32, i32) {
    %c0_i32 = arith.constant 0 : i32
    %c0_i32_0 = arith.constant 0 : i32
    %c0_i32_1 = arith.constant 0 : i32
    %c0_i32_2 = arith.constant 0 : i32
    return %arg0, %c0_i32, %c0_i32_0, %c0_i32_1 : i32, i32, i32, i32
  }
  func.func @transform_1(%arg0: i32, %arg1: i32, %arg2: i32) -> (i32, i32) {
    %c0_i32 = arith.constant 0 : i32
    %c0_i32_0 = arith.constant 0 : i32
    return %c0_i32, %arg1 : i32, i32
  }
  func.func @transform_2(%arg0: i32, %arg1: i32, %arg2: i32) -> (i32, i32, i32) {
    %c0_i32 = arith.constant 0 : i32
    return %arg0, %arg2, %arg1 : i32, i32, i32
  }
}

</mosaic_0001>

<bundles_post_ra>
// kernel: conv2d_pallas.1
= control target key start
LH: loop header
LB: loop body
LE: loop exit
PB: predicated region body
PF: predicated region fallthrough
CT: control target
= control target key end

     0   :  { %s6348_s9 = smov 0   ;;  %s6350_s10 = smov 0   ;;  %s8116_s0 = inlined_call_operand.vmem [shape: bf16[2,18,18,8], index: 0, kind: input, shape index: {}]   ;;  %s8117_s1 = inlined_call_operand.vmem [shape: bf16[72,128], index: 1, kind: input, shape index: {}]   ;;  %s8118_s2 = inlined_call_operand.vmem [shape: f32[2,256,128], index: 2, kind: output, shape index: {}]  }
   0x1   :  { %s6352_s11 = smov 0  }
   0x2 LB: > { %s31_s12 = sadd.s32 1, %s6327_s10  ;;  %p4917_p0 = scmp.ge.s32.totalorder %s6331_s11, 1  ;;  %s6331_s11 = sphi %s6352_s11, %s12_s11   ;;  %s6327_s10 = sphi %s6350_s10, %s8187_s10   ;;  %s6323_s9 = sphi %s6348_s9, %s8186_s9  }
   0x3   : > { %p33_p1 = scmp.ge.s32.totalorder %s31_s12, 2  ;;  %p144_p2 = scmp.lt.s32.totalorder %s6331_s11, 3 }
   0x5   : > { %s8189_s12 = smov (%p33_p1, %s31_s12), 0  ;;  %p145_p3 = pnand %p4917_p0, %p144_p2 }
   0x7   : > { %148 = sbr.rel (%p145_p3) target bundleno = 584 (0x248), region = 28 }
   0xe   : > { %v640_v0 = vld [vmem:[%s8117_s1 + $0x4] sm:$0xf]  ;;  %vm738_vm0 = vcmask 1043456   ;;  %v2444_v1 = vld [vmem:[%s8117_s1 + $0x10] sm:$0xf]  ;;  %p177_p4 = scmp.lt.s32.totalorder %s6323_s9, 1 }
   0xf   : > { %6169 = vmatprep.subr.msk.bf16.mxu1 %vm738_vm0, %v640_v0  ;;  %6173 = vmatprep.subr.msk.bf16.mxu0 %vm738_vm0, %v2444_v1  ;;  %v740_v2 = vsel %vm738_vm0, %v640_v0, 0  ;;  %v6376_v3 = vsel %vm738_vm0, %v2444_v1, 0  ;;  %v236_v4 = vld [vmem:[%s8117_s1] sm:$0xf]  ;;  %v2913_v5 = vld [vmem:[%s8117_s1 + $0x14] sm:$0xf] }
  0x10   : > { %8132 = vst [vmem:[#allocation2_spill] sm:$0xff] %v6376_v3  ;;  %5606 = vmatpush3.bf16.msra.mxu1 %v740_v2  ;;  %5742 = vmatpush3.bf16.msra.mxu0 %v6376_v3  ;;  %s8191_s9 = smov (!%p177_p4, %s6323_s9), 1  ;;  %vm253_vm1 = vsmask.f32 3328  ;;  %vm254_vm2 = vsmask.f32 7440 }
  0x11   : > { %6170 = vmatprep.subr.msk.bf16.mxu1 %vm738_vm0, %v236_v4  ;;  %6175 = vmatprep.subr.msk.bf16.mxu0 %vm738_vm0, %v2913_v5  ;;  %s6179_s21 = smul.u32 216, %s8191_s9  ;;  %vm689_vm3 = vcmask 64512   ;;  %v6406_v17 = vsel %vm738_vm0, %v236_v4, 0  ;;  %v6412_v26 = vld [vmem:[%s8117_s1 + $0x18] sm:$0xf]  ;;  %vm6419_vm4 = vmor %vm253_vm1, %vm254_vm2  ;;  %v6425_v37 = vsel %vm738_vm0, %v2913_v5, 0 }
  0x12   : > { %v6429_v41 = vsel %vm738_vm0, %v6412_v26, 0  ;;  %vm1243_vm5 = vcmask 1042432   ;;  %vm1244_vm6 = vcmask 1046532   ;;  %s5451_s15 = sshll.u32 %s8191_s9, 8 }
  0x13   : > { %s6393_s24 = scalar_lea.vmem %s8116_s0, %s6179_s21  ;;  %vm6645_vm7 = vmor %vm1243_vm5, %vm1244_vm6  ;;  %s8073_s18 = scalar_lea.vmem %s8118_s2, %s5451_s15 }
  0x14   : > { %v204_v6 = vld [vmem:[%s6393_s24] sm:$0xf]  ;;  %v205_v7 = vld [vmem:[%s6393_s24 + $0x4] sm:$0xf]  ;;  %v237_v8 = vld [vmem:[%s6393_s24 + $0x8] sm:$0x1] }
  0x15   : > { %v257_v9 = vshrl.u32 %v204_v6, 16  ;;  %v260_v10 = vshll.u32 %v204_v6, 16  ;;  %v266_v11 = vshll.u32 %v205_v7, 16  ;;  %v270_v12 = vshrl.u32 %v205_v7, 16  ;;  %v5097_v13 = vld [vmem:[%s6393_s24 + $0xc] sm:$0xf] }
  0x16   : > { %v276_v14 = vshll.u32 %v237_v8, 16  ;;  %v6400_v15 = vld [vmem:[%s6393_s24 + $0x10] sm:$0xf]  ;;  %v6403_v16 = vld [vmem:[%s6393_s24 + $0x14] sm:$0x1]  ;;  %v2061_v23 = vshrl.u32 %v5097_v13, 16 }
  0x17   : > { %v259_v18 = vrot.slane %v257_v9, 4  ;;  %v262_v19 = vrot.slane %v260_v10, 5  ;;  %v268_v20 = vrot.slane %v266_v11, 5  ;;  %v272_v21 = vrot.slane %v270_v12, 4  ;;  %v206_v31 = vld [vmem:[%s6393_s24 + $0xc] sm:$0xf] }
  0x18   : > { %v278_v22 = vrot.slane %v276_v14, 5  ;;  %v2064_v24 = vshll.u32 %v5097_v13, 16  ;;  %v2070_v25 = vshll.u32 %v6400_v15, 16  ;;  %v2074_v29 = vshrl.u32 %v6400_v15, 16  ;;  %v207_v36 = vld [vmem:[%s6393_s24 + $0x10] sm:$0xf] }
  0x19   : > { %v263_v27 = vor.u32 %v262_v19, %v259_v18  ;;  %v273_v28 = vor.u32 %v272_v21, %v268_v20  ;;  %v2080_v30 = vshll.u32 %v6403_v16, 16  ;;  %v2063_v33 = vrot.slane %v2061_v23, 4  ;;  %v238_v44 = vld [vmem:[%s6393_s24 + $0x14] sm:$0x1]  ;;  %v5100_v55 = vld [vmem:[%s6393_s24 + $0x18] sm:$0xf] }
  0x1a   : > { %v2066_v34 = vrot.slane %v2064_v24, 5  ;;  %v2072_v35 = vrot.slane %v2070_v25, 5  ;;  %v2076_v40 = vrot.slane %v2074_v29, 4  ;;  %v281_v45 = vshrl.u32 %v206_v31, 16  ;;  %v6438_v60 = vld [vmem:[%s6393_s24 + $0x1c] sm:$0xf] }
  0x1b   : > { %v264_v38 = vrot.slane %v263_v27, 4  ;;  %v274_v39 = vrot.slane %v273_v28, 4  ;;  %v2082_v43 = vrot.slane %v2080_v30, 5  ;;  %v284_v46 = vshll.u32 %v206_v31, 16  ;;  %v6446_v1 = vld [vmem:[%s6393_s24 + $0x20] sm:$0x1] }
  0x1c   : > { %v2067_v42 = vor.u32 %v2066_v34, %v2063_v33  ;;  %v2077_v49 = vor.u32 %v2076_v40, %v2072_v35  ;;  %v290_v50 = vshll.u32 %v207_v36, 16  ;;  %v283_v53 = vrot.slane %v281_v45, 4  ;;  %v208_v18 = vld [vmem:[%s6393_s24 + $0x18] sm:$0xf]  ;;  %v209_v23 = vld [vmem:[%s6393_s24 + $0x1c] sm:$0xf] }
  0x1d   : > { %v269_v47 = vsel %vm6419_vm4, %v264_v38, %v268_v20  ;;  %v279_v48 = vsel %vm6419_vm4, %v274_v39, %v278_v22  ;;  %v286_v54 = vrot.slane %v284_v46, 5  ;;  %v294_v58 = vshrl.u32 %v207_v36, 16  ;;  %v239_v31 = vld [vmem:[%s6393_s24 + $0x20] sm:$0x1]  ;;  %v5103_v40 = vld [vmem:[%s6393_s24 + $0x24] sm:$0xf] }
  0x1e   : > { %v4921_v51 = vcombine.low %v269_v47, %v279_v48  ;;  %v2068_v52 = vrot.slane %v2067_v42, 4  ;;  %v2078_v56 = vrot.slane %v2077_v49, 4  ;;  %v292_v57 = vrot.slane %v290_v50, 5  ;;  %v6469_v46 = vld [vmem:[%s6393_s24 + $0x28] sm:$0xf] }
  0x1f   : > { %v300_v59 = vshll.u32 %v238_v44, 16  ;;  %v2803_v62 = vrot.slane %v6400_v15, 5  ;;  %v2806_v63 = vrot.slane %v6403_v16, 5  ;;  %v287_v0 = vor.u32 %v286_v54, %v283_v53  ;;  %v6478_v54 = vld [vmem:[%s6393_s24 + $0x2c] sm:$0x1] }
  0x20   : > { %5607 = vmatprep.mubr.msk.bf16.mxu1 %vm689_vm3, %v4921_v51  ;;  %v2073_v61 = vsel %vm6419_vm4, %v2068_v52, %v2072_v35  ;;  %v2083_v2 = vsel %vm6419_vm4, %v2078_v56, %v2082_v43  ;;  %v296_v4 = vrot.slane %v294_v58, 4  ;;  %v2085_v6 = vshrl.u32 %v5100_v55, 16  ;;  %v1358_v51 = vld [vmem:[%s8117_s1 + $0x8] sm:$0xf]  ;;  %v6678_v16 = vld [vmem:[%s6393_s24 + $0x7c] sm:$0xf] }
  0x21   : > { %v302_v5 = vrot.slane %v300_v59, 5  ;;  %v5145_v7 = vcombine.low %v2073_v61, %v2083_v2  ;;  %v288_v8 = vrot.slane %v287_v0, 4  ;;  %v2088_v9 = vshll.u32 %v5100_v55, 16  ;;  %v210_v0 = vld [vmem:[%s6393_s24 + $0x24] sm:$0xf] }
  0x22   : > { %v2094_v10 = vshll.u32 %v6438_v60, 16  ;;  %v297_v11 = vor.u32 %v296_v4, %v292_v57  ;;  %v2087_v12 = vrot.slane %v2085_v6, 4  ;;  %v2098_v13 = vshrl.u32 %v6438_v60, 16 }
  0x23   : > { %v2104_v14 = vshll.u32 %v6446_v1, 16  ;;  %5743 = vmatprep.mubr.msk.bf16.mxu0 %vm689_vm3, %v5145_v7  ;;  %v293_v19 = vsel %vm6419_vm4, %v288_v8, %v292_v57  ;;  %v2090_v20 = vrot.slane %v2088_v9, 5  ;;  %v2810_v22 = vrot.slane %v6438_v60, 5  ;;  %v211_v7 = vld [vmem:[%s6393_s24 + $0x28] sm:$0xf] }
  0x24   : > { %v2096_v21 = vrot.slane %v2094_v10, 5  ;;  %v298_v24 = vrot.slane %v297_v11, 4  ;;  %v2100_v25 = vrot.slane %v2098_v13, 4  ;;  %v2813_v28 = vrot.slane %v6446_v1, 5  ;;  %v240_v13 = vld [vmem:[%s6393_s24 + $0x2c] sm:$0x1] }
  0x25   : > { %v2106_v27 = vrot.slane %v2104_v14, 5  ;;  %v2091_v29 = vor.u32 %v2090_v20, %v2087_v12  ;;  %v6462_v30 = vrot.slane %v2810_v22, 4  ;;  %v305_v33 = vshrl.u32 %v208_v18, 16 }
  0x26   : > { %v308_v34 = vshll.u32 %v208_v18, 16  ;;  %v303_v35 = vsel %vm6419_vm4, %v298_v24, %v302_v5  ;;  %v2101_v36 = vor.u32 %v2100_v25, %v2096_v21  ;;  %v314_v38 = vshll.u32 %v209_v23, 16  ;;  %v5106_v24 = vld [vmem:[%s6393_s24 + $0x30] sm:$0xf] }
  0x27   : > { %v318_v39 = vshrl.u32 %v209_v23, 16  ;;  %v4922_v42 = vcombine.low %v293_v19, %v303_v35  ;;  %v2092_v43 = vrot.slane %v2091_v29, 4  ;;  %v307_v44 = vrot.slane %v305_v33, 4  ;;  %v6498_v33 = vld [vmem:[%s6393_s24 + $0x34] sm:$0xf] }
  0x28   : > { %v310_v45 = vrot.slane %v308_v34, 5  ;;  %v2102_v47 = vrot.slane %v2101_v36, 4  ;;  %v316_v48 = vrot.slane %v314_v38, 5  ;;  %v324_v50 = vshll.u32 %v239_v31, 16 }
  0x29   : > { %v320_v49 = vrot.slane %v318_v39, 4  ;;  %5608 = vmatmul.mubr.msk.bf16.vlgmr.msra.gmra.mrb[0].mxu1 %vm689_vm3, %v4922_v42  ;;  %v2097_v52 = vsel %vm6419_vm4, %v2092_v43, %v2096_v21  ;;  %v2109_v55 = vshrl.u32 %v5103_v40, 16  ;;  %v2112_v56 = vshll.u32 %v5103_v40, 16  ;;  %v6506_v40 = vld [vmem:[%s6393_s24 + $0x38] sm:$0x1] }
  0x2a   : > { %v311_v53 = vor.u32 %v310_v45, %v307_v44  ;;  %5640 = vmatpush3.bf16.msra.mxu1 %v6406_v17  ;;  %v2107_v57 = vsel %vm6419_vm4, %v2102_v47, %v2106_v27  ;;  %v326_v59 = vrot.slane %v324_v50, 5  ;;  %v2118_v61 = vshll.u32 %v6469_v46, 16 }
  0x2b   : > { %v321_v58 = vor.u32 %v320_v49, %v316_v48  ;;  %v5146_v2 = vcombine.low %v2097_v52, %v2107_v57  ;;  %v2111_v5 = vrot.slane %v2109_v55, 4  ;;  %v2114_v6 = vrot.slane %v2112_v56, 5  ;;  %6171 = vmatprep.subr.msk.bf16.mxu1 %vm738_vm0, %v1358_v51  ;;  %v212_v52 = vld [vmem:[%s6393_s24 + $0x30] sm:$0xf] }
  0x2c   : > { %v312_v4 = vrot.slane %v311_v53, 4  ;;  %v2120_v9 = vrot.slane %v2118_v61, 5  ;;  %v2122_v17 = vshrl.u32 %v6469_v46, 16  ;;  %v2128_v10 = vshll.u32 %v6478_v54, 16 }
  0x2d   : > { %v322_v8 = vrot.slane %v321_v58, 4  ;;  %5744 = vmatmul.mubr.msk.bf16.vlgmr.msra.gmra.mrb[0].mxu0 %vm689_vm3, %v5146_v2  ;;  %v2115_v12 = vor.u32 %v2114_v6, %v2111_v5  ;;  %v329_v14 = vshrl.u32 %v210_v0, 16  ;;  %v332_v18 = vshll.u32 %v210_v0, 16  ;;  %v213_v58 = vld [vmem:[%s6393_s24 + $0x34] sm:$0xf] }
  0x2e   : > { %v317_v11 = vsel %vm6419_vm4, %v312_v4, %v316_v48  ;;  %5776 = vmatpush3.bf16.msra.mxu0 %v6425_v37  ;;  %v2124_v20 = vrot.slane %v2122_v17, 4  ;;  %v2130_v21 = vrot.slane %v2128_v10, 5  ;;  %v338_v23 = vshll.u32 %v211_v7, 16  ;;  %v241_v4 = vld [vmem:[%s6393_s24 + $0x38] sm:$0x1] }
  0x2f   : > { %v327_v19 = vsel %vm6419_vm4, %v322_v8, %v326_v59  ;;  %v2116_v27 = vrot.slane %v2115_v12, 4  ;;  %v331_v29 = vrot.slane %v329_v14, 4  ;;  %v334_v31 = vrot.slane %v332_v18, 5  ;;  %6176 = vmatprep.subr.msk.bf16.mxu0 %vm738_vm0, %v6412_v26  ;;  %v5109_v12 = vld [vmem:[%s6393_s24 + $0x3c] sm:$0xf] }
  0x30   : > { %v4923_v25 = vcombine.low %v317_v11, %v327_v19  ;;  %v2125_v34 = vor.u32 %v2124_v20, %v2120_v9  ;;  %v340_v35 = vrot.slane %v338_v23, 5  ;;  %v342_v37 = vshrl.u32 %v211_v7, 16  ;;  %v6523_v20 = vld [vmem:[%s6393_s24 + $0x40] sm:$0xf] }
  0x31   : > { %v348_v36 = vshll.u32 %v240_v13, 16  ;;  %v2121_v38 = vsel %vm6419_vm4, %v2116_v27, %v2120_v9  ;;  %v335_v39 = vor.u32 %v334_v31, %v331_v29  ;;  %v2133_v42 = vshrl.u32 %v5106_v24, 16 }
  0x32   : > { %5611 = vmatprep.mubr.msk.bf16.mxu1 %vm689_vm3, %v4923_v25  ;;  %v2136_v43 = vshll.u32 %v5106_v24, 16  ;;  %v2126_v44 = vrot.slane %v2125_v34, 4  ;;  %v344_v45 = vrot.slane %v342_v37, 4  ;;  %v2142_v26 = vshll.u32 %v6498_v33, 16  ;;  %v6528_v34 = vld [vmem:[%s6393_s24 + $0x44] sm:$0x1] }
  0x33   : > { %v350_v47 = vrot.slane %v348_v36, 5  ;;  %v336_v48 = vrot.slane %v335_v39, 4  ;;  %v2135_v49 = vrot.slane %v2133_v42, 4  ;;  %v2146_v51 = vshrl.u32 %v6498_v33, 16  ;;  %v214_v42 = vld [vmem:[%s6393_s24 + $0x3c] sm:$0xf] }
  0x34   : > { %v2138_v50 = vrot.slane %v2136_v43, 5  ;;  %v2131_v53 = vsel %vm6419_vm4, %v2126_v44, %v2130_v21  ;;  %v345_v55 = vor.u32 %v344_v45, %v340_v35  ;;  %v2144_v56 = vrot.slane %v2142_v26, 5  ;;  %v215_v26 = vld [vmem:[%s6393_s24 + $0x40] sm:$0xf] }
  0x35   : > { %v2152_v57 = vshll.u32 %v6506_v40, 16  ;;  %v5147_v59 = vcombine.low %v2121_v38, %v2131_v53  ;;  %v341_v61 = vsel %vm6419_vm4, %v336_v48, %v340_v35  ;;  %v2148_v2 = vrot.slane %v2146_v51, 4 }
  0x36   : > { %v2139_v0 = vor.u32 %v2138_v50, %v2135_v49  ;;  %v346_v5 = vrot.slane %v345_v55, 4  ;;  %v353_v7 = vshrl.u32 %v212_v52, 16  ;;  %v356_v8 = vshll.u32 %v212_v52, 16 }
  0x37   : > { %v2154_v6 = vrot.slane %v2152_v57, 5  ;;  %5747 = vmatprep.mubr.msk.bf16.mxu0 %vm689_vm3, %v5147_v59  ;;  %v2149_v17 = vor.u32 %v2148_v2, %v2144_v56  ;;  %v362_v10 = vshll.u32 %v213_v58, 16  ;;  %v366_v11 = vshrl.u32 %v213_v58, 16  ;;  %v5112_v2 = vld [vmem:[%s6393_s24 + $0x48] sm:$0xf] }
  0x38   : > { %v2140_v9 = vrot.slane %v2139_v0, 4  ;;  %v351_v13 = vsel %vm6419_vm4, %v346_v5, %v350_v47  ;;  %v355_v14 = vrot.slane %v353_v7, 4  ;;  %v358_v18 = vrot.slane %v356_v8, 5  ;;  %v6546_v8 = vld [vmem:[%s6393_s24 + $0x4c] sm:$0xf] }
  0x39   : > { %v372_v19 = vshll.u32 %v241_v4, 16  ;;  %v4924_v21 = vcombine.low %v341_v61, %v351_v13  ;;  %v2150_v24 = vrot.slane %v2149_v17, 4  ;;  %v364_v25 = vrot.slane %v362_v10, 5  ;;  %v242_v61 = vld [vmem:[%s6393_s24 + $0x44] sm:$0x1] }
  0x3a   : > { %v2145_v23 = vsel %vm6419_vm4, %v2140_v9, %v2144_v56  ;;  %v359_v27 = vor.u32 %v358_v18, %v355_v14  ;;  %v368_v29 = vrot.slane %v366_v11, 4  ;;  %v2157_v35 = vshrl.u32 %v5109_v12, 16 }
  0x3b   : > { %v374_v31 = vrot.slane %v372_v19, 5  ;;  %5612 = vmatmul.mubr.msk.bf16.gmra.mrb[4].mxu1 %vm689_vm3, %v4924_v21  ;;  %v2155_v37 = vsel %vm6419_vm4, %v2150_v24, %v2154_v6  ;;  %v2160_v36 = vshll.u32 %v5109_v12, 16  ;;  %v2166_v38 = vshll.u32 %v6523_v20, 16 }
  0x3c   : > { %v2170_v39 = vshrl.u32 %v6523_v20, 16  ;;  %v5148_v43 = vcombine.low %v2145_v23, %v2155_v37  ;;  %v360_v44 = vrot.slane %v359_v27, 4  ;;  %v369_v45 = vor.u32 %v368_v29, %v364_v25  ;;  %v6554_v23 = vld [vmem:[%s6393_s24 + $0x50] sm:$0x1]  ;;  %v6558_v27 = vld [vmem:[%s6393_s24 + $0x48] sm:$0xf] }
  0x3d   : > { %v2159_v47 = vrot.slane %v2157_v35, 4  ;;  %v2162_v48 = vrot.slane %v2160_v36, 5  ;;  %v2168_v49 = vrot.slane %v2166_v38, 5  ;;  %v2176_v51 = vshll.u32 %v6528_v34, 16  ;;  %v6561_v36 = vld [vmem:[%s6393_s24 + $0x4c] sm:$0xf] }
  0x3e   : > { %v2172_v50 = vrot.slane %v2170_v39, 4  ;;  %5748 = vmatmul.mubr.msk.bf16.gmra.mrb[4].mxu0 %vm689_vm3, %v5148_v43  ;;  %v365_v52 = vsel %vm6419_vm4, %v360_v44, %v364_v25  ;;  %v370_v53 = vrot.slane %v369_v45, 4  ;;  %v377_v55 = vshrl.u32 %v214_v42, 16 }
  0x3f   : > { %v380_v56 = vshll.u32 %v214_v42, 16  ;;  %v2163_v57 = vor.u32 %v2162_v48, %v2159_v47  ;;  %v2178_v59 = vrot.slane %v2176_v51, 5  ;;  %v386_v0 = vshll.u32 %v215_v26, 16 }
  0x40   : > { %v2173_v58 = vor.u32 %v2172_v50, %v2168_v49  ;;  %v375_v4 = vsel %vm6419_vm4, %v370_v53, %v374_v31  ;;  %v379_v5 = vrot.slane %v377_v55, 4  ;;  %v390_v7 = vshrl.u32 %v215_v26, 16  ;;  %v243_v26 = vld [vmem:[%s6393_s24 + $0x50] sm:$0x1]  ;;  %v5115_v53 = vld [vmem:[%s6393_s24 + $0x54] sm:$0xf] }
  0x41   : > { %v382_v6 = vrot.slane %v380_v56, 5  ;;  %v4925_v9 = vcombine.low %v365_v52, %v375_v4  ;;  %v2164_v17 = vrot.slane %v2163_v57, 4  ;;  %v388_v11 = vrot.slane %v386_v0, 5  ;;  %v6577_v4 = vld [vmem:[%s6393_s24 + $0x58] sm:$0xf] }
  0x42   : > { %v2174_v10 = vrot.slane %v2173_v58, 4  ;;  %v392_v13 = vrot.slane %v390_v7, 4  ;;  %v396_v14 = vshll.u32 %v242_v61, 16  ;;  %v2181_v18 = vshrl.u32 %v5112_v2, 16 }
  0x43   : > { %v383_v12 = vor.u32 %v382_v6, %v379_v5  ;;  %5615 = vmatprep.mubr.msk.bf16.mxu1 %vm689_vm3, %v4925_v9  ;;  %v2169_v19 = vsel %vm6419_vm4, %v2164_v17, %v2168_v49  ;;  %v2184_v24 = vshll.u32 %v5112_v2, 16  ;;  %v2190_v25 = vshll.u32 %v6546_v8, 16 }
  0x44   : > { %v2179_v21 = vsel %vm6419_vm4, %v2174_v10, %v2178_v59  ;;  %v393_v35 = vor.u32 %v392_v13, %v388_v11  ;;  %v398_v37 = vrot.slane %v396_v14, 5  ;;  %v2183_v38 = vrot.slane %v2181_v18, 4 }
  0x45   : > { %v5149_v29 = vcombine.low %v2169_v19, %v2179_v21  ;;  %v384_v31 = vrot.slane %v383_v12, 4  ;;  %v2186_v39 = vrot.slane %v2184_v24, 5  ;;  %v2192_v42 = vrot.slane %v2190_v25, 5  ;;  %v6583_v12 = vld [vmem:[%s6393_s24 + $0x5c] sm:$0x1] }
  0x46   : > { %v2194_v43 = vshrl.u32 %v6546_v8, 16  ;;  %v394_v45 = vrot.slane %v393_v35, 4  ;;  %v2200_v47 = vshll.u32 %v6554_v23, 16  ;;  %v401_v48 = vshrl.u32 %v6558_v27, 16  ;;  %v6587_v24 = vld [vmem:[%s6393_s24 + $0x54] sm:$0xf] }
  0x47   : > { %5751 = vmatprep.mubr.msk.bf16.mxu0 %vm689_vm3, %v5149_v29  ;;  %v389_v44 = vsel %vm6419_vm4, %v384_v31, %v388_v11  ;;  %v2187_v49 = vor.u32 %v2186_v39, %v2183_v38  ;;  %v404_v51 = vshll.u32 %v6558_v27, 16  ;;  %v410_v52 = vshll.u32 %v6561_v36, 16 }
  0x48   : > { %v2196_v50 = vrot.slane %v2194_v43, 4  ;;  %v399_v55 = vsel %vm6419_vm4, %v394_v45, %v398_v37  ;;  %v2202_v56 = vrot.slane %v2200_v47, 5  ;;  %v403_v57 = vrot.slane %v401_v48, 4  ;;  %v6593_v37 = vld [vmem:[%s6393_s24 + $0x58] sm:$0xf] }
  0x49   : > { %v414_v58 = vshrl.u32 %v6561_v36, 16  ;;  %v4926_v59 = vcombine.low %v389_v44, %v399_v55  ;;  %v2188_v61 = vrot.slane %v2187_v49, 4  ;;  %v406_v2 = vrot.slane %v404_v51, 5 }
  0x4a   : > { %v2197_v0 = vor.u32 %v2196_v50, %v2192_v42  ;;  %v412_v5 = vrot.slane %v410_v52, 5  ;;  %v420_v7 = vshll.u32 %v243_v26, 16  ;;  %v2205_v9 = vshrl.u32 %v5115_v53, 16  ;;  %v244_v26 = vld [vmem:[%s6393_s24 + $0x5c] sm:$0x1] }
  0x4b   : > { %v416_v6 = vrot.slane %v414_v58, 4  ;;  %5616 = vmatmul.mubr.msk.bf16.gmra.mrb[8].mxu1 %vm689_vm3, %v4926_v59  ;;  %v2193_v17 = vsel %vm6419_vm4, %v2188_v61, %v2192_v42  ;;  %v407_v11 = vor.u32 %v406_v2, %v403_v57  ;;  %v2208_v13 = vshll.u32 %v5115_v53, 16  ;;  %v5118_v53 = vld [vmem:[%s6393_s24 + $0x60] sm:$0xf]  ;;  %v6607_v59 = vld [vmem:[%s6393_s24 + $0x64] sm:$0xf] }
  0x4c   : > { %v2198_v10 = vrot.slane %v2197_v0, 4  ;;  %v422_v18 = vrot.slane %v420_v7, 5  ;;  %v2207_v19 = vrot.slane %v2205_v9, 4  ;;  %v2214_v21 = vshll.u32 %v6577_v4, 16  ;;  %v6614_v9 = vld [vmem:[%s6393_s24 + $0x68] sm:$0x1] }
  0x4d   : > { %v417_v14 = vor.u32 %v416_v6, %v412_v5  ;;  %v408_v29 = vrot.slane %v407_v11, 4  ;;  %v2210_v31 = vrot.slane %v2208_v13, 5  ;;  %v2218_v35 = vshrl.u32 %v6577_v4, 16 }
  0x4e   : > { %v2203_v25 = vsel %vm6419_vm4, %v2198_v10, %v2202_v56  ;;  %v2216_v42 = vrot.slane %v2214_v21, 5  ;;  %v2224_v43 = vshll.u32 %v6583_v12, 16  ;;  %v425_v48 = vshrl.u32 %v6587_v24, 16 }
  0x4f   : > { %v5150_v38 = vcombine.low %v2193_v17, %v2203_v25  ;;  %v418_v39 = vrot.slane %v417_v14, 4  ;;  %v413_v44 = vsel %vm6419_vm4, %v408_v29, %v412_v5  ;;  %v2211_v45 = vor.u32 %v2210_v31, %v2207_v19  ;;  %v6618_v19 = vld [vmem:[%s6393_s24 + $0x60] sm:$0xf] }
  0x50   : > { %v2220_v47 = vrot.slane %v2218_v35, 4  ;;  %v2226_v50 = vrot.slane %v2224_v43, 5  ;;  %v428_v51 = vshll.u32 %v6587_v24, 16  ;;  %v434_v52 = vshll.u32 %v6593_v37, 16  ;;  %v6624_v35 = vld [vmem:[%s6393_s24 + $0x64] sm:$0xf] }
  0x51   : > { %5752 = vmatmul.mubr.msk.bf16.gmra.mrb[8].mxu0 %vm689_vm3, %v5150_v38  ;;  %v423_v49 = vsel %vm6419_vm4, %v418_v39, %v422_v18  ;;  %v2212_v56 = vrot.slane %v2211_v45, 4  ;;  %v427_v58 = vrot.slane %v425_v48, 4  ;;  %v438_v2 = vshrl.u32 %v6593_v37, 16 }
  0x52   : > { %v4927_v55 = vcombine.low %v413_v44, %v423_v49  ;;  %v2221_v57 = vor.u32 %v2220_v47, %v2216_v42  ;;  %v430_v61 = vrot.slane %v428_v51, 5  ;;  %v436_v0 = vrot.slane %v434_v52, 5 }
  0x53   : > { %v444_v5 = vshll.u32 %v244_v26, 16  ;;  %v2217_v6 = vsel %vm6419_vm4, %v2212_v56, %v2216_v42  ;;  %v2229_v17 = vshrl.u32 %v5118_v53, 16  ;;  %v2232_v10 = vshll.u32 %v5118_v53, 16 }
  0x54   : > { %5619 = vmatprep.mubr.msk.bf16.mxu1 %vm689_vm3, %v4927_v55  ;;  %v2222_v7 = vrot.slane %v2221_v57, 4  ;;  %v431_v11 = vor.u32 %v430_v61, %v427_v58  ;;  %v440_v13 = vrot.slane %v438_v2, 4  ;;  %v2238_v18 = vshll.u32 %v6607_v59, 16  ;;  %v5177_v58 = vld [vmem:[%s6393_s24 + $0xc] sm:$0xe] }
  0x55   : > { %v446_v14 = vrot.slane %v444_v5, 5  ;;  %v2231_v25 = vrot.slane %v2229_v17, 4  ;;  %v2234_v29 = vrot.slane %v2232_v10, 5  ;;  %v2242_v31 = vshrl.u32 %v6607_v59, 16 }
  0x56   : > { %v2227_v21 = vsel %vm6419_vm4, %v2222_v7, %v2226_v50  ;;  %v432_v39 = vrot.slane %v431_v11, 4  ;;  %v441_v42 = vor.u32 %v440_v13, %v436_v0  ;;  %v2240_v43 = vrot.slane %v2238_v18, 5  ;;  %v245_v50 = vld [vmem:[%s6393_s24 + $0x68] sm:$0x1] }
  0x57   : > { %v5151_v38 = vcombine.low %v2217_v6, %v2227_v21  ;;  %v2235_v44 = vor.u32 %v2234_v29, %v2231_v25  ;;  %v2244_v45 = vrot.slane %v2242_v31, 4  ;;  %v2248_v47 = vshll.u32 %v6614_v9, 16  ;;  %v6652_v29 = vld [vmem:[%s6393_s24 + $0x70] sm:$0xf] }
  0x58   : > { %v449_v26 = vshrl.u32 %v6618_v19, 16  ;;  %v437_v48 = vsel %vm6419_vm4, %v432_v39, %v436_v0  ;;  %v442_v49 = vrot.slane %v441_v42, 4  ;;  %v452_v51 = vshll.u32 %v6618_v19, 16  ;;  %v6639_v0 = vld [vmem:[%s6393_s24 + $0x6c] sm:$0xf] }
  0x59   : > { %5755 = vmatprep.mubr.msk.bf16.mxu0 %vm689_vm3, %v5151_v38  ;;  %v458_v52 = vshll.u32 %v6624_v35, 16  ;;  %v2236_v53 = vrot.slane %v2235_v44, 4  ;;  %v2245_v55 = vor.u32 %v2244_v45, %v2240_v43  ;;  %v2250_v56 = vrot.slane %v2248_v47, 5 }
  0x5a   : > { %v451_v57 = vrot.slane %v449_v26, 4  ;;  %v447_v61 = vsel %vm6419_vm4, %v442_v49, %v446_v14  ;;  %v454_v2 = vrot.slane %v452_v51, 5  ;;  %v462_v6 = vshrl.u32 %v6624_v35, 16  ;;  %v246_v26 = vld [vmem:[%s6393_s24 + $0x74] sm:$0x1] }
  0x5b   : > { %v460_v5 = vrot.slane %v458_v52, 5  ;;  %v4928_v7 = vcombine.low %v437_v48, %v447_v61  ;;  %v2241_v17 = vsel %vm6419_vm4, %v2236_v53, %v2240_v43  ;;  %v2246_v10 = vrot.slane %v2245_v55, 4  ;;  %v5178_v48 = vld [vmem:[%s6393_s24 + $0x18] sm:$0xe] }
  0x5c   : > { %v468_v11 = vshll.u32 %v245_v50, 16  ;;  %v455_v14 = vor.u32 %v454_v2, %v451_v57  ;;  %v464_v18 = vrot.slane %v462_v6, 4  ;;  %v5193_v21 = vrot.slane %v5177_v58, 9  ;;  %v6671_v53 = vld [vmem:[%s6393_s24 + $0x78] sm:$0xf] }
  0x5d   : > { %v2805_v25 = vrot.slane %v2803_v62, 4  ;;  %5620 = vmatmul.mubr.msk.bf16.gmra.mrb[12].mxu1 %vm689_vm3, %v4928_v7  ;;  %v2251_v31 = vsel %vm6419_vm4, %v2246_v10, %v2250_v56  ;;  %v473_v39 = vshrl.u32 %v6639_v0, 16  ;;  %v476_v42 = vshll.u32 %v6639_v0, 16  ;;  %v247_v57 = vld [vmem:[%s6393_s24 + $0x80] sm:$0x1] }
  0x5e   : > { %v470_v38 = vrot.slane %v468_v11, 5  ;;  %v5152_v43 = vcombine.low %v2241_v17, %v2251_v31  ;;  %v456_v44 = vrot.slane %v455_v14, 4  ;;  %v465_v45 = vor.u32 %v464_v18, %v460_v5  ;;  %v5179_v10 = vld [vmem:[%s6393_s24 + $0x24] sm:$0xe] }
  0x5f   : > { %v2804_v47 = vsel %vm6645_vm7, %v5193_v21, %v2803_v62  ;;  %v2807_v49 = vsel %vm6645_vm7, %v2805_v25, %v2806_v63  ;;  %v475_v50 = vrot.slane %v473_v39, 4  ;;  %v478_v51 = vrot.slane %v476_v42, 5  ;;  %v6697_v39 = vld [vmem:[%s6393_s24 + $0x84] sm:$0xf] }
  0x60   : > { %v482_v52 = vshll.u32 %v6652_v29, 16  ;;  %5756 = vmatmul.mubr.msk.bf16.gmra.mrb[12].mxu0 %vm689_vm3, %v5152_v43  ;;  %v461_v15 = vsel %vm6419_vm4, %v456_v44, %v460_v5  ;;  %v466_v62 = vrot.slane %v465_v45, 4  ;;  %v5209_v55 = vcombine.low %v2804_v47, %v2807_v49  ;;  %v6705_v43 = vld [vmem:[%s6393_s24 + $0x88] sm:$0xf] }
  0x61   : > { %v486_v56 = vshrl.u32 %v6652_v29, 16  ;;  %v479_v63 = vor.u32 %v478_v51, %v475_v50  ;;  %v492_v61 = vshll.u32 %v246_v26, 16  ;;  %v5194_v2 = vrot.slane %v5178_v48, 9 }
  0x62   : > { %v484_v58 = vrot.slane %v482_v52, 5  ;;  %v471_v6 = vsel %vm6419_vm4, %v466_v62, %v470_v38  ;;  %5777 = vmatprep.mubr.msk.bf16.mxu0 %vm689_vm3, %v5209_v55  ;;  %v2814_v5 = vsel %vm6645_vm7, %v6462_v30, %v2813_v28  ;;  %v497_v17 = vshrl.u32 %v6671_v53, 16  ;;  %v248_v52 = vld [vmem:[%s6393_s24 + $0x8c] sm:$0x1] }
  0x63   : > { %v488_v7 = vrot.slane %v486_v56, 4  ;;  %v4929_v11 = vcombine.low %v461_v15, %v471_v6  ;;  %v480_v14 = vrot.slane %v479_v63, 4  ;;  %v494_v18 = vrot.slane %v492_v61, 5 }
  0x64   : > { %v2811_v21 = vsel %vm6645_vm7, %v5194_v2, %v2810_v22  ;;  %v499_v38 = vrot.slane %v497_v17, 4  ;;  %v500_v1 = vshll.u32 %v6671_v53, 16  ;;  %v506_v30 = vshll.u32 %v6678_v16, 16  ;;  %v6710_v22 = vld [vmem:[%s8117_s1 + $0x1c] sm:$0xf] }
  0x65   : > { %v489_v25 = vor.u32 %v488_v7, %v484_v58  ;;  %v5210_v31 = vcombine.low %v2811_v21, %v2814_v5  ;;  %5623 = vmatprep.mubr.msk.bf16.mxu1 %vm689_vm3, %v4929_v11  ;;  %v485_v28 = vsel %vm6419_vm4, %v480_v14, %v484_v58  ;;  %v510_v60 = vshrl.u32 %v6678_v16, 16  ;;  %v6729_v5 = vld [vmem:[%s6393_s24 + $0x90] sm:$0xf] }
  0x66   : > { %v516_v42 = vshll.u32 %v247_v57, 16  ;;  %v502_v45 = vrot.slane %v500_v1, 5  ;;  %v5195_v47 = vrot.slane %v5179_v10, 9  ;;  %v2817_v26 = vrot.slane %v6469_v46, 5  ;;  %v5180_v57 = vld [vmem:[%s6393_s24 + $0x30] sm:$0xe] }
  0x67   : > { %v490_v44 = vrot.slane %v489_v25, 4  ;;  %v508_v48 = vrot.slane %v506_v30, 5  ;;  %v512_v49 = vrot.slane %v510_v60, 4  ;;  %v2820_v51 = vrot.slane %v6478_v54, 5  ;;  %v6741_v30 = vld [vmem:[%s6393_s24 + $0x94] sm:$0xf] }
  0x68   : > { %v518_v50 = vrot.slane %v516_v42, 5  ;;  %5778 = vmatmul.mubr.msk.bf16.vlgmr.msra.gmra.mrb[0].mxu0 %vm689_vm3, %v5210_v31  ;;  %v503_v62 = vor.u32 %v502_v45, %v499_v38  ;;  %v2818_v55 = vsel %vm6645_vm7, %v5195_v47, %v2817_v26  ;;  %v2819_v56 = vrot.slane %v2817_v26, 4  ;;  %v249_v60 = vld [vmem:[%s6393_s24 + $0x98] sm:$0x1]  ;;  %v5181_v26 = vld [vmem:[%s6393_s24 + $0x3c] sm:$0xe] }
  0x69   : > { %v495_v15 = vsel %vm6419_vm4, %v490_v44, %v494_v18  ;;  %5810 = vmatpush3.bf16.msra.mxu0 %v6429_v41  ;;  %v513_v46 = vor.u32 %v512_v49, %v508_v48  ;;  %v521_v58 = vshrl.u32 %v6697_v39, 16  ;;  %v524_v54 = vshll.u32 %v6697_v39, 16 }
  0x6a   : > { %v4930_v63 = vcombine.low %v485_v28, %v495_v15  ;;  %v504_v61 = vrot.slane %v503_v62, 4  ;;  %v2821_v2 = vsel %vm6645_vm7, %v2819_v56, %v2820_v51  ;;  %v530_v6 = vshll.u32 %v6705_v43, 16  ;;  %6177 = vmatprep.subr.msk.bf16.mxu0 %vm738_vm0, %v6710_v22 }
  0x6b   : > { %v534_v7 = vshrl.u32 %v6705_v43, 16  ;;  %v514_v41 = vrot.slane %v513_v46, 4  ;;  %v5211_v17 = vcombine.low %v2818_v55, %v2821_v2  ;;  %v523_v10 = vrot.slane %v521_v58, 4  ;;  %v6761_v46 = vld [vmem:[%s6393_s24 + $0xa0] sm:$0xf] }
  0x6c   : > { %5624 = vmatmul.mubr.msk.bf16.gmra.mrb[16].mxu1 %vm689_vm3, %v4930_v63  ;;  %v526_v11 = vrot.slane %v524_v54, 5  ;;  %v509_v14 = vsel %vm6419_vm4, %v504_v61, %v508_v48  ;;  %v532_v18 = vrot.slane %v530_v6, 5  ;;  %v540_v25 = vshll.u32 %v248_v52, 16  ;;  %v6750_v52 = vld [vmem:[%s6393_s24 + $0x9c] sm:$0xf] }
  0x6d   : > { %v536_v21 = vrot.slane %v534_v7, 4  ;;  %v519_v31 = vsel %vm6419_vm4, %v514_v41, %v518_v50  ;;  %5781 = vmatprep.mubr.msk.bf16.mxu0 %vm689_vm3, %v5211_v17  ;;  %v5196_v1 = vrot.slane %v5180_v57, 9  ;;  %v2824_v28 = vrot.slane %v6498_v33, 5 }
  0x6e   : > { %v527_v38 = vor.u32 %v526_v11, %v523_v10  ;;  %v4931_v42 = vcombine.low %v509_v14, %v519_v31  ;;  %v542_v45 = vrot.slane %v540_v25, 5  ;;  %v2827_v47 = vrot.slane %v6506_v40, 5  ;;  %v250_v10 = vld [vmem:[%s6393_s24 + $0xa4] sm:$0x1]  ;;  %v5182_v11 = vld [vmem:[%s6393_s24 + $0x48] sm:$0xe] }
  0x6f   : > { %v537_v44 = vor.u32 %v536_v21, %v532_v18  ;;  %v2825_v49 = vsel %vm6645_vm7, %v5196_v1, %v2824_v28  ;;  %v2826_v50 = vrot.slane %v2824_v28, 4  ;;  %v545_v51 = vshrl.u32 %v6729_v5, 16 }
  0x70   : > { %v528_v48 = vrot.slane %v527_v38, 4  ;;  %5627 = vmatprep.mubr.msk.bf16.mxu1 %vm689_vm3, %v4931_v42  ;;  %v548_v15 = vshll.u32 %v6729_v5, 16  ;;  %v554_v62 = vshll.u32 %v6741_v30, 16  ;;  %v558_v40 = vshrl.u32 %v6741_v30, 16 }
  0x71   : > { %v538_v33 = vrot.slane %v537_v44, 4  ;;  %v2828_v56 = vsel %vm6645_vm7, %v2826_v50, %v2827_v47  ;;  %v547_v57 = vrot.slane %v545_v51, 4  ;;  %v564_v63 = vshll.u32 %v249_v60, 16 }
  0x72   : > { %v533_v55 = vsel %vm6419_vm4, %v528_v48, %v532_v18  ;;  %v5212_v54 = vcombine.low %v2825_v49, %v2828_v56  ;;  %v550_v61 = vrot.slane %v548_v15, 5  ;;  %v556_v2 = vrot.slane %v554_v62, 5  ;;  %v6787_v56 = vld [vmem:[%s6393_s24 + $0xac] sm:$0xf] }
  0x73   : > { %v543_v58 = vsel %vm6419_vm4, %v538_v33, %v542_v45  ;;  %v560_v7 = vrot.slane %v558_v40, 4  ;;  %v566_v41 = vrot.slane %v564_v63, 5  ;;  %v5197_v17 = vrot.slane %v5181_v26, 9  ;;  %v6782_v33 = vld [vmem:[%s6393_s24 + $0xa8] sm:$0xf] }
  0x74   : > { %v4932_v6 = vcombine.low %v533_v55, %v543_v58  ;;  %5782 = vmatmul.mubr.msk.bf16.gmra.mrb[4].mxu0 %vm689_vm3, %v5212_v54  ;;  %v551_v14 = vor.u32 %v550_v61, %v547_v57  ;;  %v2831_v18 = vrot.slane %v6523_v20, 5  ;;  %v2834_v21 = vrot.slane %v6528_v34, 5  ;;  %v251_v61 = vld [vmem:[%s6393_s24 + $0xb0] sm:$0x1] }
  0x75   : > { %v569_v25 = vshrl.u32 %v6750_v52, 16  ;;  %v561_v31 = vor.u32 %v560_v7, %v556_v2  ;;  %v572_v38 = vshll.u32 %v6750_v52, 16  ;;  %v578_v1 = vshll.u32 %v6761_v46, 16 }
  0x76   : > { %5628 = vmatmul.mubr.msk.bf16.gmra.mrb[20].mxu1 %vm689_vm3, %v4932_v6  ;;  %v582_v28 = vshrl.u32 %v6761_v46, 16  ;;  %v552_v60 = vrot.slane %v551_v14, 4  ;;  %v2832_v42 = vsel %vm6645_vm7, %v5197_v17, %v2831_v18  ;;  %v2833_v20 = vrot.slane %v2831_v18, 4  ;;  %v6802_v14 = vld [vmem:[%s6393_s24 + $0xb4] sm:$0xf] }
  0x77   : > { %v571_v44 = vrot.slane %v569_v25, 4  ;;  %v562_v34 = vrot.slane %v561_v31, 4  ;;  %v574_v45 = vrot.slane %v572_v38, 5  ;;  %v580_v47 = vrot.slane %v578_v1, 5 }
  0x78   : > { %v584_v26 = vrot.slane %v582_v28, 4  ;;  %v557_v48 = vsel %vm6419_vm4, %v552_v60, %v556_v2  ;;  %v2835_v49 = vsel %vm6645_vm7, %v2833_v20, %v2834_v21  ;;  %v588_v50 = vshll.u32 %v250_v10, 16  ;;  %v5183_v2 = vld [vmem:[%s6393_s24 + $0x54] sm:$0xe] }
  0x79   : > { %v5198_v51 = vrot.slane %v5182_v11, 9  ;;  %v567_v15 = vsel %vm6419_vm4, %v562_v34, %v566_v41  ;;  %v5213_v62 = vcombine.low %v2832_v42, %v2835_v49  ;;  %v575_v40 = vor.u32 %v574_v45, %v571_v44  ;;  %v6811_v42 = vld [vmem:[%s6393_s24 + $0xb8] sm:$0xf]  ;;  %v252_v49 = vld [vmem:[%s6393_s24 + $0xbc] sm:$0x1] }
  0x7a   : > { %v585_v55 = vor.u32 %v584_v26, %v580_v47  ;;  %v4933_v57 = vcombine.low %v557_v48, %v567_v15  ;;  %v590_v63 = vrot.slane %v588_v50, 5  ;;  %v2838_v58 = vrot.slane %v6546_v8, 5 }
  0x7b   : > { %v2841_v54 = vrot.slane %v6554_v23, 5  ;;  %5785 = vmatprep.mubr.msk.bf16.mxu0 %vm689_vm3, %v5213_v62  ;;  %v576_v6 = vrot.slane %v575_v40, 4  ;;  %v593_v41 = vshrl.u32 %v6782_v33, 16  ;;  %v596_v17 = vshll.u32 %v6782_v33, 16 }
  0x7c   : > { %v586_v7 = vrot.slane %v585_v55, 4  ;;  %5631 = vmatprep.mubr.msk.bf16.mxu1 %vm689_vm3, %v4933_v57  ;;  %v2839_v10 = vsel %vm6645_vm7, %v5198_v51, %v2838_v58  ;;  %v2840_v11 = vrot.slane %v2838_v58, 4  ;;  %v602_v8 = vshll.u32 %v6787_v56, 16  ;;  %v5184_v55 = vld [vmem:[%s6393_s24 + $0x60] sm:$0xe] }
  0x7d   : > { %v606_v23 = vshrl.u32 %v6787_v56, 16  ;;  %v581_v18 = vsel %vm6419_vm4, %v576_v6, %v580_v47  ;;  %v595_v25 = vrot.slane %v593_v41, 4  ;;  %v598_v31 = vrot.slane %v596_v17, 5  ;;  %v5185_v6 = vld [vmem:[%s6393_s24 + $0x6c] sm:$0xe] }
  0x7e   : > { %v591_v21 = vsel %vm6419_vm4, %v586_v7, %v590_v63  ;;  %v2842_v1 = vsel %vm6645_vm7, %v2840_v11, %v2841_v54  ;;  %v604_v28 = vrot.slane %v602_v8, 5  ;;  %v612_v34 = vshll.u32 %v251_v61, 16  ;;  %v5122_v11 = vld [vmem:[%s6393_s24 + $0x70] sm:$0xf]  ;;  %v5123_v8 = vld [vmem:[%s6393_s24 + $0x74] sm:$0x1] }
  0x7f   : > { %v4934_v38 = vcombine.low %v581_v18, %v591_v21  ;;  %v608_v60 = vrot.slane %v606_v23, 4  ;;  %v5214_v20 = vcombine.low %v2839_v10, %v2842_v1  ;;  %v599_v44 = vor.u32 %v598_v31, %v595_v25 }
  0x80   : > { %v5199_v45 = vrot.slane %v5183_v2, 9  ;;  %v2845_v26 = vrot.slane %v6577_v4, 5  ;;  %v2848_v48 = vrot.slane %v6583_v12, 5  ;;  %v617_v50 = vshrl.u32 %v6802_v14, 16 }
  0x81   : > { %5632 = vmatmul.mubr.msk.bf16.gmra.mrb[24].mxu1 %vm689_vm3, %v4934_v38  ;;  %v609_v47 = vor.u32 %v608_v60, %v604_v28  ;;  %5786 = vmatmul.mubr.msk.bf16.gmra.mrb[8].mxu0 %vm689_vm3, %v5214_v20  ;;  %v600_v51 = vrot.slane %v599_v44, 4  ;;  %v614_v15 = vrot.slane %v612_v34, 5  ;;  %v620_v62 = vshll.u32 %v6802_v14, 16 }
  0x82   : > { %v626_v40 = vshll.u32 %v6811_v42, 16  ;;  %v2846_v4 = vsel %vm6645_vm7, %v5199_v45, %v2845_v26  ;;  %v2847_v12 = vrot.slane %v2845_v26, 4  ;;  %v619_v63 = vrot.slane %v617_v50, 4 }
  0x83   : > { %v610_v57 = vrot.slane %v609_v47, 4  ;;  %v605_v58 = vsel %vm6419_vm4, %v600_v51, %v604_v28  ;;  %v622_v54 = vrot.slane %v620_v62, 5  ;;  %v630_v2 = vshrl.u32 %v6811_v42, 16  ;;  %v5186_v47 = vld [vmem:[%s6393_s24 + $0x78] sm:$0xe] }
  0x84   : > { %v628_v61 = vrot.slane %v626_v40, 5  ;;  %v2849_v41 = vsel %vm6645_vm7, %v2847_v12, %v2848_v48  ;;  %v636_v17 = vshll.u32 %v252_v49, 16  ;;  %v5200_v10 = vrot.slane %v5184_v55, 9  ;;  %v6252_v51 = vld [vmem:[%s6393_s24] sm:$0xf] }
  0x85   : > { %v615_v7 = vsel %vm6419_vm4, %v610_v57, %v614_v15  ;;  %v5215_v18 = vcombine.low %v2846_v4, %v2849_v41  ;;  %v623_v21 = vor.u32 %v622_v54, %v619_v63  ;;  %v632_v25 = vrot.slane %v630_v2, 4  ;;  %v6849_v15 = vld [vmem:[%s6393_s24 + $0x4] sm:$0xf]  ;;  %v6853_v40 = vld [vmem:[%s6393_s24 + $0x7c] sm:$0xf] }
  0x86   : > { %v4935_v23 = vcombine.low %v605_v58, %v615_v7  ;;  %v638_v31 = vrot.slane %v636_v17, 5  ;;  %v2852_v38 = vrot.slane %v6607_v59, 5  ;;  %v2855_v1 = vrot.slane %v6614_v9, 5  ;;  %v6856_v55 = vld [vmem:[%s6393_s24 + $0x80] sm:$0x1] }
  0x87   : > { %v5201_v28 = vrot.slane %v5185_v6, 9  ;;  %5789 = vmatprep.mubr.msk.bf16.mxu0 %vm689_vm3, %v5215_v18  ;;  %v624_v60 = vrot.slane %v623_v21, 4  ;;  %v633_v20 = vor.u32 %v632_v25, %v628_v61  ;;  %v2859_v44 = vrot.slane %v5122_v11, 5  ;;  %v5128_v57 = vld [vmem:[%s6393_s24 + $0x88] sm:$0xf] }
  0x88   : > { %5635 = vmatprep.mubr.msk.bf16.mxu1 %vm689_vm3, %v4935_v23  ;;  %v2862_v34 = vrot.slane %v5123_v8, 5  ;;  %v2853_v45 = vsel %vm6645_vm7, %v5200_v10, %v2852_v38  ;;  %v2854_v59 = vrot.slane %v2852_v38, 4  ;;  %v4953_v62 = vcombine.low %v6252_v51, %v6849_v15  ;;  %v5129_v54 = vld [vmem:[%s6393_s24 + $0x8c] sm:$0x1]  ;;  %v5131_v17 = vld [vmem:[%s6393_s24 + $0x94] sm:$0xf] }
  0x89   : > { %v629_v9 = vsel %vm6419_vm4, %v624_v60, %v628_v61  ;;  %v634_v26 = vrot.slane %v633_v20, 4  ;;  %v2860_v48 = vsel %vm6645_vm7, %v5201_v28, %v2859_v44  ;;  %v2861_v49 = vrot.slane %v2859_v44, 4  ;;  %v5187_v61 = vld [vmem:[%s6393_s24 + $0x84] sm:$0xe]  ;;  %v5188_v23 = vld [vmem:[%s6393_s24 + $0x90] sm:$0xe] }
  0x8a   : > { %v2856_v50 = vsel %vm6645_vm7, %v2854_v59, %v2855_v1  ;;  %v5202_v58 = vrot.slane %v5186_v47, 9  ;;  %v2866_v7 = vrot.slane %v6853_v40, 5  ;;  %v2869_v41 = vrot.slane %v6856_v55, 5  ;;  %v5132_v25 = vld [vmem:[%s6393_s24 + $0x98] sm:$0x1] }
  0x8b   : > { %v639_v4 = vsel %vm6419_vm4, %v634_v26, %v638_v31  ;;  %v5216_v12 = vcombine.low %v2853_v45, %v2856_v50  ;;  %v2863_v63 = vsel %vm6645_vm7, %v2861_v49, %v2862_v34  ;;  %v5203_v10 = vrot.slane %v5187_v61, 9  ;;  %v5134_v31 = vld [vmem:[%s6393_s24 + $0xa0] sm:$0xf]  ;;  %v5135_v60 = vld [vmem:[%s6393_s24 + $0xa4] sm:$0x1] }
  0x8c   : > { %v4936_v2 = vcombine.low %v629_v9, %v639_v4  ;;  %v5217_v6 = vcombine.low %v2860_v48, %v2863_v63  ;;  %v2873_v11 = vrot.slane %v5128_v57, 5  ;;  %v2876_v8 = vrot.slane %v5129_v54, 5  ;;  %v5189_v20 = vld [vmem:[%s6393_s24 + $0x9c] sm:$0xe]  ;;  %v6254_v44 = vld [vmem:[%s6393_s24 + $0xc] sm:$0xf] }
  0x8d   : > { %5790 = vmatmul.mubr.msk.bf16.gmra.mrb[12].mxu0 %vm689_vm3, %v5216_v12  ;;  %v2867_v18 = vsel %vm6645_vm7, %v5202_v58, %v2866_v7  ;;  %v2868_v21 = vrot.slane %v2866_v7, 4  ;;  %v2880_v28 = vrot.slane %v5131_v17, 5  ;;  %v6883_v34 = vld [vmem:[%s6393_s24 + $0x10] sm:$0xf]  ;;  %v6256_v47 = vld [vmem:[%s6393_s24 + $0x18] sm:$0xf] }
  0x8e   : > { %5636 = vmatmul.mubr.msk.bf16.gmra.mrb[28].mxu1 %vm689_vm3, %v4936_v2  ;;  %5793 = vmatprep.mubr.msk.bf16.mxu0 %vm689_vm3, %v5217_v6  ;;  %v2874_v38 = vsel %vm6645_vm7, %v5203_v10, %v2873_v11  ;;  %v2875_v1 = vrot.slane %v2873_v11, 4  ;;  %v4954_v45 = vcombine.low %v6254_v44, %v6883_v34  ;;  %v6890_v9 = vld [vmem:[%s6393_s24 + $0x1c] sm:$0xf]  ;;  %v5204_v48 = vrot.slane %v5188_v23, 9  ;;  %v5137_v57 = vld [vmem:[%s6393_s24 + $0xac] sm:$0xf] }
  0x8f   : > { %5641 = vmatprep.mubr.msk.bf16.mxu1 %vm689_vm3, %v4953_v62  ;;  %v2870_v59 = vsel %vm6645_vm7, %v2868_v21, %v2869_v41  ;;  %v4955_v26 = vcombine.low %v6256_v47, %v6890_v9  ;;  %v2882_v51 = vrot.slane %v2880_v28, 4  ;;  %v2883_v62 = vrot.slane %v5132_v25, 5  ;;  %v6258_v54 = vld [vmem:[%s8117_s1 + $0x8] sm:$0xf]  ;;  %v5140_v2 = vld [vmem:[%s6393_s24 + $0xb8] sm:$0xf] }
  0x90   : > { %v5218_v49 = vcombine.low %v2867_v18, %v2870_v59  ;;  %v2877_v50 = vsel %vm6645_vm7, %v2875_v1, %v2876_v8  ;;  %v5205_v12 = vrot.slane %v5189_v20, 9  ;;  %v2887_v63 = vrot.slane %v5134_v31, 5  ;;  %v6905_v7 = vld [vmem:[%s8117_s1 + $0xc] sm:$0xf]  ;;  %v5138_v10 = vld [vmem:[%s6393_s24 + $0xb0] sm:$0x1] }
  0x91   : > { %v5219_v4 = vcombine.low %v2874_v38, %v2877_v50  ;;  %v2890_v58 = vrot.slane %v5135_v60, 5  ;;  %v1456_v61 = vsel %vm738_vm0, %v6258_v54, 0  ;;  %v2881_v41 = vsel %vm6645_vm7, %v5204_v48, %v2880_v28  ;;  %v5190_v11 = vld [vmem:[%s6393_s24 + $0xa8] sm:$0xe]  ;;  %v5141_v25 = vld [vmem:[%s6393_s24 + $0xbc] sm:$0x1] }
  0x92   : > { %v2889_v6 = vrot.slane %v2887_v63, 4  ;;  %v2884_v17 = vsel %vm6645_vm7, %v2882_v51, %v2883_v62  ;;  %v2894_v8 = vrot.slane %v5137_v57, 5  ;;  %v2888_v23 = vsel %vm6645_vm7, %v5205_v12, %v2887_v63  ;;  %v5191_v31 = vld [vmem:[%s6393_s24 + $0xb4] sm:$0xe]  ;;  %v6259_v38 = vld [vmem:[%s6393_s24 + $0x24] sm:$0xf] }
  0x93   : > { %v2901_v21 = vrot.slane %v5140_v2, 5  ;;  %v6926_v1 = vld [vmem:[%s6393_s24 + $0x28] sm:$0xf]  ;;  %v5220_v60 = vcombine.low %v2881_v41, %v2884_v17  ;;  %v5206_v44 = vrot.slane %v5190_v11, 9  ;;  %v2897_v59 = vrot.slane %v5138_v10, 5 }
  0x94   : > { %v2891_v18 = vsel %vm6645_vm7, %v2889_v6, %v2890_v58  ;;  %v4956_v28 = vcombine.low %v6259_v38, %v6926_v1  ;;  %v6261_v47 = vld [vmem:[%s6393_s24 + $0x30] sm:$0xf]  ;;  %v2904_v51 = vrot.slane %v5141_v25, 5  ;;  %v5143_v62 = vld [vmem:[%s6393_s24 + $0xc4] sm:$0xf]  ;;  %v2290_v25 = vshrl.u32 %v6853_v40, 16 }
  0x95   : > { %5794 = vmatmul.mubr.msk.bf16.gmra.mrb[16].mxu0 %vm689_vm3, %v5218_v49  ;;  %v5221_v20 = vcombine.low %v2888_v23, %v2891_v18  ;;  %v5207_v49 = vrot.slane %v5191_v31, 9  ;;  %v2903_v50 = vrot.slane %v2901_v21, 4  ;;  %v2895_v57 = vsel %vm6645_vm7, %v5206_v44, %v2894_v8  ;;  %v5192_v12 = vld [vmem:[%s6393_s24 + $0xc0] sm:$0xe]  ;;  %v6263_v41 = vld [vmem:[%s6393_s24 + $0x3c] sm:$0xf] }
  0x96   : > { %5642 = vmatmul.mubr.msk.bf16.vlgmr.msra.gmra.mrb[0].mxu1 %vm689_vm3, %v4954_v45  ;;  %5797 = vmatprep.mubr.msk.bf16.mxu0 %vm689_vm3, %v5219_v4  ;;  %v2896_v45 = vrot.slane %v2894_v8, 4  ;;  %v2908_v63 = vrot.slane %v5143_v62, 5  ;;  %v5208_v6 = vrot.slane %v5192_v12, 9  ;;  %v6951_v17 = vld [vmem:[%s6393_s24 + $0x40] sm:$0xf]  ;;  %v4959_v18 = vcombine.low %v6558_v27, %v6561_v36  ;;  %v6215_v62 = vld [vmem:[%s6393_s24 + $0x24] sm:$0xff]  }
  0x97   : > { %5674 = vmatpush3.bf16.msra.mxu1 %v1456_v61  ;;  %5645 = vmatprep.mubr.msk.bf16.mxu1 %vm689_vm3, %v4955_v26  ;;  %v6931_v26 = vld [vmem:[%s6393_s24 + $0x34] sm:$0xf]  ;;  %v2902_v58 = vsel %vm6645_vm7, %v5207_v49, %v2901_v21  ;;  %v2905_v54 = vsel %vm6645_vm7, %v2903_v50, %v2904_v51  ;;  %v5144_v61 = vld [vmem:[%s6393_s24 + $0xc8] sm:$0x1]  ;;  %v4958_v10 = vcombine.low %v6263_v41, %v6951_v17  ;;  %v2286_v21 = vshll.u32 %v6853_v40, 16 }
  0x98   : > { %6172 = vmatprep.subr.msk.bf16.mxu1 %vm738_vm0, %v6905_v7  ;;  %v4957_v48 = vcombine.low %v6261_v47, %v6931_v26  ;;  %v2898_v4 = vsel %vm6645_vm7, %v2896_v45, %v2897_v59  ;;  %v5223_v11 = vcombine.low %v2902_v58, %v2905_v54  ;;  %v2910_v8 = vrot.slane %v2908_v63, 4  ;;  %v1195_v45 = vld [vmem:[%s6393_s24] sm:$0xe]  ;;  %v1196_v59 = vld [vmem:[%s6393_s24 + $0xc] sm:$0xe] }
  0x99   : > { %v5222_v2 = vcombine.low %v2895_v57, %v2898_v4  ;;  %v2911_v23 = vrot.slane %v5144_v61, 5  ;;  %v2909_v31 = vsel %vm6645_vm7, %v5208_v6, %v2908_v63  ;;  %v6966_v27 = vrot.slane %v2286_v21, 5  ;;  %v1199_v41 = vld [vmem:[%s6393_s24 + $0x30] sm:$0xe] }
  0x9a   : > { %v2292_v36 = vrot.slane %v2290_v25, 4  ;;  %v4961_v44 = vcombine.low %v6618_v19, %v6624_v35  ;;  %v2296_v47 = vshll.u32 %v6856_v55, 16  ;;  %v4985_v19 = vrot.slane %v1195_v45, 9 }
  0x9b   : > { %v2912_v38 = vsel %vm6645_vm7, %v2910_v8, %v2911_v23  ;;  %8137 = vst [vmem:[#allocation3_spill] sm:$0xff] %v6966_v27  ;;  %v4986_v35 = vrot.slane %v1196_v59, 9  ;;  %v1262_v4 = vrot.slane %v6890_v9, 5  ;;  %v1269_v12 = vrot.slane %v6926_v1, 5  ;;  %v1200_v8 = vld [vmem:[%s6393_s24 + $0x3c] sm:$0xe] }
  0x9c   : > { %v5224_v40 = vcombine.low %v2909_v31, %v2912_v38  ;;  %v2293_v49 = vor.u32 %v2292_v36, %v6966_v27  ;;  %v6986_v51 = vrot.slane %v2296_v47, 5  ;;  %v4962_v58 = vcombine.low %v6639_v0, %v6652_v29  ;;  %v1201_v31 = vld [vmem:[%s6393_s24 + $0x48] sm:$0xe]  ;;  %v6269_v59 = vld [vmem:[%s6393_s24 + $0x38] sm:$0x1] }
  0x9d   : > { %5798 = vmatmul.mubr.msk.bf16.gmra.mrb[20].mxu0 %vm689_vm3, %v5220_v60  ;;  %v4960_v60 = vcombine.low %v6587_v24, %v6593_v37  ;;  %v6266_v24 = vld [vmem:[%s6393_s24 + $0x14] sm:$0x1]  ;;  %v4097_v54 = vsel %vm738_vm0, %v6710_v22, 0  ;;  %v4963_v61 = vcombine.low %v6671_v53, %v6678_v16  ;;  %v4964_v6 = vcombine.low %v6697_v39, %v6705_v43  ;;  %v6267_v16 = vld [vmem:[%s6393_s24 + $0x20] sm:$0x1] }
  0x9e   : > { %5646 = vmatmul.mubr.msk.bf16.gmra.mrb[4].mxu1 %vm689_vm3, %v4956_v28  ;;  %5801 = vmatprep.mubr.msk.bf16.mxu0 %vm689_vm3, %v5221_v20  ;;  %v1255_v28 = vrot.slane %v6883_v34, 5  ;;  %v6213_v20 = vld [vmem:[%s6393_s24 + $0x18] sm:$0xff]   ;;  %v6265_v34 = vld [vmem:[%s6393_s24 + $0x8] sm:$0x1]  ;;  %v1258_v37 = vrot.slane %v6266_v24, 5  ;;  %8138 = vst [vmem:[#allocation4_spill] sm:$0xff] %v6986_v51  ;;  %v4965_v9 = vcombine.low %v6729_v5, %v6741_v30 }
  0x9f   : > { %5649 = vmatprep.mubr.msk.bf16.mxu1 %vm689_vm3, %v4957_v48  ;;  %v1248_v48 = vrot.slane %v6849_v15, 5  ;;  %v1251_v50 = vrot.slane %v6265_v34, 5  ;;  %v1197_v15 = vld [vmem:[%s6393_s24 + $0x18] sm:$0xe]  ;;  %v6991_v63 = vrot.slane %v2293_v49, 4  ;;  %v1265_v22 = vrot.slane %v6267_v16, 5 }
  0xa0   : > { %v1257_v55 = vrot.slane %v1255_v28, 4  ;;  %v4987_v1 = vrot.slane %v1197_v15, 9  ;;  %v7013_v29 = vsel %vm6645_vm7, %v4986_v35, %v1255_v28  ;;  %v1271_v25 = vrot.slane %v1269_v12, 4  ;;  %v5305_v24 = vld [vmem:[%s6393_s24 + $0x18] sm:$0xf] }
  0xa1   : > { %v1250_v57 = vrot.slane %v1248_v48, 4  ;;  %8139 = vst [vmem:[#allocation5_spill] sm:$0xff] %v6991_v63  ;;  %v7009_v0 = vsel %vm6645_vm7, %v4985_v19, %v1248_v48  ;;  %v1279_v47 = vrot.slane %v6269_v59, 5  ;;  %v7050_v49 = vsel %vm738_vm0, %v6905_v7, 0  ;;  %v5306_v7 = vld [vmem:[%s6393_s24 + $0x1c] sm:$0xf] }
  0xa2   : > { %v7017_v53 = vsel %vm6645_vm7, %v1257_v55, %v1258_v37  ;;  %v7054_v34 = vsel %vm6645_vm7, %v4987_v1, %v1262_v4  ;;  %v6219_v37 = vld [vmem:[%s6393_s24 + $0x3c] sm:$0xff]   ;;  %v4990_v35 = vrot.slane %v1200_v8, 9  ;;  %v6270_v55 = vld [vmem:[%s6393_s24 + $0x44] sm:$0x1]  ;;  %v3619_v8 = vshll.u32 %v5305_v24, 16 }
  0xa3   : > { %v7028_v23 = vsel %vm6645_vm7, %v1250_v57, %v1251_v50  ;;  %v1202_v50 = vld [vmem:[%s6393_s24 + $0x54] sm:$0xe]  ;;  %v1286_v15 = vrot.slane %v6270_v55, 5  ;;  %v5309_v39 = vld [vmem:[%s6393_s24 + $0x28] sm:$0xf] }
  0xa4   : > { %v6277_v5 = vld [vmem:[%s6393_s24 + $0x70] sm:$0xf] }
  0xa5   : > { %5802 = vmatmul.mubr.msk.bf16.gmra.mrb[24].mxu0 %vm689_vm3, %v5222_v2  ;;  %v1198_v2 = vld [vmem:[%s6393_s24 + $0x24] sm:$0xe]  ;;  %v1311_v30 = vrot.slane %v6277_v5, 5 }
  0xa6   : > { %5650 = vmatmul.mubr.msk.bf16.gmra.mrb[8].mxu1 %vm689_vm3, %v4958_v10  ;;  %5805 = vmatprep.mubr.msk.bf16.mxu0 %vm689_vm3, %v5223_v11  ;;  %v1276_v10 = vrot.slane %v6931_v26, 5  ;;  %v6217_v11 = vld [vmem:[%s6393_s24 + $0x30] sm:$0xff]   ;;  %v7024_v26 = vld [vmem:[%s8117_s1 + $0x20] sm:$0xf]  ;;  %v4988_v21 = vrot.slane %v1198_v2, 9 }
  0xa7   : > { %5653 = vmatprep.mubr.msk.bf16.mxu1 %vm689_vm3, %v4959_v18  ;;  %v1264_v18 = vrot.slane %v1262_v4, 4  ;;  %v1313_v48 = vrot.slane %v1311_v30, 4 }
  0xa8   : > { %v1278_v45 = vrot.slane %v1276_v10, 4  ;;  %v7061_v19 = vsel %vm6645_vm7, %v4988_v21, %v1269_v12  ;;  %v3629_v21 = vshrl.u32 %v5306_v7, 16 }
  0xa9   : > { %v7070_v4 = vsel %vm6645_vm7, %v1264_v18, %v1265_v22  ;;  %v3616_v22 = vshrl.u32 %v5305_v24, 16  ;;  %v3625_v18 = vshll.u32 %v5306_v7, 16  ;;  %v5308_v24 = vld [vmem:[%s6393_s24 + $0x24] sm:$0xf] }
  0xaa   : > { %v7083_v1 = vsel %vm6645_vm7, %v1278_v45, %v1279_v47 }
  0xab   : > { %v3618_v43 = vrot.slane %v3616_v22, 4  ;;  %v7125_v7 = vrot.slane %v3625_v18, 5  ;;  %v3643_v22 = vshll.u32 %v5308_v24, 16  ;;  %v3653_v18 = vshrl.u32 %v5309_v39, 16 }
  0xad   : > { %5806 = vmatmul.mubr.msk.bf16.gmra.mrb[28].mxu0 %vm689_vm3, %v5224_v40  ;;  %v6268_v40 = vld [vmem:[%s6393_s24 + $0x2c] sm:$0x1]  ;;  %v3645_v27 = vrot.slane %v3643_v22, 5 }
  0xae   : > { %5654 = vmatmul.mubr.msk.bf16.gmra.mrb[12].mxu1 %vm689_vm3, %v4960_v60  ;;  %5811 = vmatprep.mubr.msk.bf16.mxu0 %vm689_vm3, %v6213_v20  ;;  %v1272_v28 = vrot.slane %v6268_v40, 5  ;;  %v1283_v60 = vrot.slane %v6951_v17, 5  ;;  %v6273_v40 = vld [vmem:[%s6393_s24 + $0x50] sm:$0x1]  ;;  %v6278_v17 = vld [vmem:[%s6393_s24 + $0x74] sm:$0x1] }
  0xaf   : > { %5657 = vmatprep.mubr.msk.bf16.mxu1 %vm689_vm3, %v4961_v44  ;;  %v4989_v44 = vrot.slane %v1199_v41, 9  ;;  %v4992_v41 = vrot.slane %v1202_v50, 9  ;;  %v1203_v50 = vld [vmem:[%s6393_s24 + $0x60] sm:$0xe]  ;;  %v5310_v20 = vld [vmem:[%s6393_s24 + $0x2c] sm:$0x1] }
  0xb0   : > { %v1285_v12 = vrot.slane %v1283_v60, 4  ;;  %v7096_v45 = vsel %vm6645_vm7, %v4990_v35, %v1283_v60  ;;  %v6274_v35 = vld [vmem:[%s6393_s24 + $0x5c] sm:$0x1] }
  0xb1   : > { %v7079_v2 = vsel %vm6645_vm7, %v4989_v44, %v1276_v10  ;;  %v1300_v55 = vrot.slane %v6274_v35, 5  ;;  %v1204_v35 = vld [vmem:[%s6393_s24 + $0x6c] sm:$0xe] }
  0xb2   : > { %v7100_v59 = vsel %vm6645_vm7, %v1285_v12, %v1286_v15  ;;  %v6275_v15 = vld [vmem:[%s6393_s24 + $0x64] sm:$0xf]  ;;  %v3631_v12 = vrot.slane %v3629_v21, 4  ;;  %v4994_v5 = vrot.slane %v1204_v35, 9 }
  0xb3   : > { %v6225_v21 = vld [vmem:[%s6393_s24 + $0x60] sm:$0xff]  }
  0xb5   : > { %5812 = vmatmul.mubr.msk.bf16.vlgmr.msra.gmra.mrb[0].mxu0 %vm689_vm3, %v6215_v62  ;;  %v6271_v62 = vld [vmem:[%s6393_s24 + $0x4c] sm:$0xf] }
  0xb6   : > { %5658 = vmatmul.mubr.msk.bf16.gmra.mrb[16].mxu1 %vm689_vm3, %v4962_v58  ;;  %5844 = vmatpush3.bf16.msra.mxu0 %v4097_v54  ;;  %v1290_v57 = vrot.slane %v6271_v62, 5  ;;  %v7074_v58 = vsel %vm6645_vm7, %v1271_v25, %v1272_v28  ;;  %v4991_v54 = vrot.slane %v1201_v31, 9  ;;  %v1293_v28 = vrot.slane %v6273_v40, 5 }
  0xb7   : > { %5661 = vmatprep.mubr.msk.bf16.mxu1 %vm689_vm3, %v4963_v61  ;;  %5815 = vmatprep.mubr.msk.bf16.mxu0 %vm689_vm3, %v6217_v11  ;;  %v6221_v61 = vld [vmem:[%s6393_s24 + $0x48] sm:$0xff]   ;;  %v6272_v11 = vld [vmem:[%s6393_s24 + $0x58] sm:$0xf]  ;;  %v1304_v62 = vrot.slane %v6275_v15, 5  ;;  %v5312_v15 = vld [vmem:[%s6393_s24 + $0x34] sm:$0xf] }
  0xb8   : > { %6178 = vmatprep.subr.msk.bf16.mxu0 %vm738_vm0, %v7024_v26  ;;  %v1297_v16 = vrot.slane %v6272_v11, 5  ;;  %v1292_v31 = vrot.slane %v1290_v57, 4  ;;  %v7104_v47 = vsel %vm6645_vm7, %v4991_v54, %v1290_v57  ;;  %v5307_v57 = vld [vmem:[%s6393_s24 + $0x20] sm:$0x1]  ;;  %v5311_v54 = vld [vmem:[%s6393_s24 + $0x30] sm:$0xf] }
  0xb9   : > { %v4993_v11 = vrot.slane %v1203_v50, 9  ;;  %v3667_v50 = vshll.u32 %v5311_v54, 16  ;;  %v3635_v25 = vshll.u32 %v5307_v57, 16  ;;  %v3673_v36 = vshll.u32 %v5312_v15, 16 }
  0xba   : > { %v7115_v60 = vsel %vm6645_vm7, %v4992_v41, %v1297_v16  ;;  %v7131_v41 = vsel %vm6645_vm7, %v1292_v31, %v1293_v28  ;;  %v1306_v31 = vrot.slane %v1304_v62, 4  ;;  %v3664_v28 = vshrl.u32 %v5311_v54, 16 }
  0xbb   : > { %v7173_v35 = vrot.slane %v3673_v36, 5 }
  0xbd   : > { %5816 = vmatmul.mubr.msk.bf16.gmra.mrb[4].mxu0 %vm689_vm3, %v6219_v37  ;;  %v1299_v37 = vrot.slane %v1297_v16, 4  ;;  %v6276_v16 = vld [vmem:[%s6393_s24 + $0x68] sm:$0x1] }
  0xbe   : > { %5662 = vmatmul.mubr.msk.bf16.gmra.mrb[20].mxu1 %vm689_vm3, %v4964_v6  ;;  %5819 = vmatprep.mubr.msk.bf16.mxu0 %vm689_vm3, %v6221_v61  ;;  %v3621_v6 = vrot.slane %v3619_v8, 5  ;;  %v6223_v61 = vld [vmem:[%s6393_s24 + $0x54] sm:$0xff]   ;;  %v1307_v40 = vrot.slane %v6276_v16, 5  ;;  %v3649_v8 = vshll.u32 %v5309_v39, 16  ;;  %v3632_v16 = vor.u32 %v3631_v12, %v7125_v7 }
  0xbf   : > { %5665 = vmatprep.mubr.msk.bf16.mxu1 %vm689_vm3, %v4965_v9  ;;  %v3640_v9 = vshrl.u32 %v5308_v24, 16  ;;  %v7140_v44 = vsel %vm6645_vm7, %v1299_v37, %v1300_v55  ;;  %v1314_v24 = vrot.slane %v6278_v17, 5  ;;  %v3677_v39 = vshrl.u32 %v5312_v15, 16 }
  0xc0   : > { %v3622_v10 = vor.u32 %v3621_v6, %v3618_v43  ;;  %v7146_v37 = vrot.slane %v3649_v8, 5  ;;  %v3655_v55 = vrot.slane %v3653_v18, 4  ;;  %v8140_v43 = vcombine.low %v6750_v52, %v6761_v46  ;;  %v6279_v8 = vld [vmem:[%s6393_s24 + $0x7c] sm:$0xf]  ;;  %v7182_v18 = vld [vmem:[%s6393_s24 + $0x38] sm:$0x1] }
  0xc1   : > { %v3642_v38 = vrot.slane %v3640_v9, 4  ;;  %v7155_v17 = vsel %vm6645_vm7, %v4993_v11, %v1304_v62  ;;  %v7159_v57 = vsel %vm6645_vm7, %v1306_v31, %v1307_v40  ;;  %v3666_v6 = vrot.slane %v3664_v28, 4  ;;  %8142 = vst [vmem:[#allocation6_spill] sm:$0xff] %v7182_v18 }
  0xc2   : > { %v3669_v12 = vrot.slane %v3667_v50, 5  ;;  %v8141_v52 = vcombine.low %v6782_v33, %v6787_v56  ;;  %v3623_v46 = vrot.slane %v3622_v10, 4  ;;  %v3633_v54 = vrot.slane %v3632_v16, 4  ;;  %v6227_v33 = vld [vmem:[%s6393_s24 + $0x6c] sm:$0xff]   ;;  %v1206_v16 = vld [vmem:[%s6393_s24 + $0x84] sm:$0xe] }
  0xc3   : > { %v3659_v62 = vshll.u32 %v5310_v20, 16  ;;  %v7167_v11 = vsel %vm6645_vm7, %v4994_v5, %v1311_v30  ;;  %v7171_v40 = vsel %vm6645_vm7, %v1313_v48, %v1314_v24  ;;  %v3679_v9 = vrot.slane %v3677_v39, 4  ;;  %v6228_v48 = vld [vmem:[%s6393_s24 + $0x78] sm:$0xff]  }
  0xc4   : > { %v3646_v10 = vor.u32 %v3645_v27, %v3642_v38  ;;  %v3656_v20 = vor.u32 %v3655_v55, %v7146_v37  ;;  %v1318_v30 = vrot.slane %v6279_v8, 5  ;;  %v3670_v38 = vor.u32 %v3669_v12, %v3666_v6  ;;  %v5314_v5 = vld [vmem:[%s6393_s24 + $0x3c] sm:$0xf] }
  0xc5   : > { %5820 = vmatmul.mubr.msk.bf16.gmra.mrb[8].mxu0 %vm689_vm3, %v6223_v61  ;;  %v3637_v61 = vrot.slane %v3635_v25, 5  ;;  %v1205_v25 = vld [vmem:[%s6393_s24 + $0x78] sm:$0xe]  ;;  %v7198_v50 = vrot.slane %v3659_v62, 5  ;;  %v3680_v39 = vor.u32 %v3679_v9, %v7173_v35  ;;  %v3683_v55 = vshll.u32 %v7182_v18, 16 }
  0xc6   : > { %5666 = vmatmul.mubr.msk.bf16.gmra.mrb[24].mxu1 %vm689_vm3, %v8140_v43  ;;  %5823 = vmatprep.mubr.msk.bf16.mxu0 %vm689_vm3, %v6225_v21  ;;  %v3628_v21 = vsel %vm6419_vm4, %v3623_v46, %v7125_v7  ;;  %v4995_v24 = vrot.slane %v1205_v25, 9  ;;  %v6280_v43 = vld [vmem:[%s6393_s24 + $0x88] sm:$0xf]  ;;  %v7206_v7 = vld [vmem:[%s6393_s24 + $0x40] sm:$0xf]  ;;  %v3647_v12 = vrot.slane %v3646_v10, 4  ;;  %v8144_v62 = vcombine.low %v6802_v14, %v6811_v42 }
  0xc7   : > { %5669 = vmatprep.mubr.msk.bf16.mxu1 %vm689_vm3, %v8141_v52  ;;  %v3638_v31 = vsel %vm6419_vm4, %v3633_v54, %v3637_v61  ;;  %v1325_v6 = vrot.slane %v6280_v43, 5  ;;  %8143 = vst [vmem:[#allocation7_spill] sm:$0xff] %v7206_v7  ;;  %v3657_v52 = vrot.slane %v3656_v20, 4  ;;  %v1320_v46 = vrot.slane %v1318_v30, 4  ;;  %v6281_v54 = vld [vmem:[%s6393_s24 + $0x80] sm:$0x1] }
  0xc8   : > { %v1321_v61 = vrot.slane %v6281_v54, 5  ;;  %v3671_v9 = vrot.slane %v3670_v38, 4  ;;  %v4996_v25 = vrot.slane %v1206_v16, 9  ;;  %v3688_v8 = vshrl.u32 %v5314_v5, 16  ;;  %v6229_v10 = vld [vmem:[%s6393_s24 + $0x84] sm:$0xff]  }
  0xc9   : > { %v3691_v43 = vshll.u32 %v5314_v5, 16  ;;  %v7220_v20 = vcombine.low %v3628_v21, %v3638_v31  ;;  %v7224_v14 = vsel %vm738_vm0, %v7024_v26, 0  ;;  %v3701_v38 = vshrl.u32 %v7206_v7, 16  ;;  %v6230_v21 = vld [vmem:[%s6393_s24 + $0x90] sm:$0xff]   ;;  %v6286_v18 = vld [vmem:[%s6393_s24 + $0xa0] sm:$0xf] }
  0xca   : > { %v3681_v16 = vrot.slane %v3680_v39, 4  ;;  %v3685_v5 = vrot.slane %v3683_v55, 5  ;;  %v1327_v54 = vrot.slane %v1325_v6, 4  ;;  %v3652_v31 = vsel %vm6419_vm4, %v3647_v12, %v7146_v37 }
  0xcb   : > { %v3662_v26 = vsel %vm6419_vm4, %v3657_v52, %v7198_v50  ;;  %v7239_v39 = vsel %vm6645_vm7, %v4995_v24, %v1318_v30  ;;  %v7243_v55 = vsel %vm6645_vm7, %v1320_v46, %v1321_v61  ;;  %v3676_v37 = vsel %vm6419_vm4, %v3671_v9, %v7173_v35  ;;  %v5320_v30 = vld [vmem:[%s6393_s24 + $0x54] sm:$0xf]  ;;  %v7260_v24 = vld [vmem:[%s6393_s24 + $0x58] sm:$0xf]  ;;  %v7265_v61 = vld [vmem:[%s6393_s24 + $0x90] sm:$0xe] }
  0xcc   : > { %v7256_v12 = vsel %vm6645_vm7, %v4996_v25, %v1325_v6  ;;  %v3690_v50 = vrot.slane %v3688_v8, 4  ;;  %v3693_v52 = vrot.slane %v3691_v43, 5  ;;  %v3703_v46 = vrot.slane %v3701_v38, 4 }
  0xcd   : > { %5824 = vmatmul.mubr.msk.bf16.gmra.mrb[12].mxu0 %vm689_vm3, %v6227_v33  ;;  %v8145_v33 = vcombine.low %v7009_v0, %v7028_v23  ;;  %v6282_v0 = vld [vmem:[%s6393_s24 + $0x8c] sm:$0x1]  ;;  %v3686_v36 = vsel %vm6419_vm4, %v3681_v16, %v3685_v5  ;;  %v3736_v25 = vshrl.u32 %v5320_v30, 16  ;;  %v3739_v8 = vshll.u32 %v5320_v30, 16 }
  0xce   : > { %5670 = vmatmul.mubr.msk.bf16.gmra.mrb[28].mxu1 %vm689_vm3, %v8144_v62  ;;  %5827 = vmatprep.mubr.msk.bf16.mxu0 %vm689_vm3, %v6228_v48  ;;  %v3697_v48 = vshll.u32 %v7206_v7, 16  ;;  %v1328_v23 = vrot.slane %v6282_v0, 5  ;;  %v5317_v62 = vld [vmem:[%s6393_s24 + $0x48] sm:$0xf]  ;;  %v7249_v0 = vld [vmem:[%s6393_s24 + $0x4c] sm:$0xf]  ;;  %v8147_v38 = vcombine.low %v7013_v29, %v7017_v53  ;;  %v7283_v16 = vcombine.low %v3652_v31, %v3662_v26 }
  0xcf   : > { %5675 = vmatprep.mubr.msk.bf16.mxu1 %vm689_vm3, %v8145_v33  ;;  %v7246_v33 = vld [vmem:[%s6393_s24 + $0x44] sm:$0x1]  ;;  %v3712_v27 = vshrl.u32 %v5317_v62, 16  ;;  %v3715_v15 = vshll.u32 %v5317_v62, 16  ;;  %v3721_v6 = vshll.u32 %v7249_v0, 16  ;;  %v3725_v9 = vshrl.u32 %v7249_v0, 16 }
  0xd0   : > { %8146 = vst [vmem:[#allocation8_spill] sm:$0xff] %v7246_v33  ;;  %v7262_v28 = vrot.slane %v3697_v48, 5  ;;  %v7271_v35 = vsel %vm6645_vm7, %v1327_v54, %v1328_v23  ;;  %v3745_v43 = vshll.u32 %v7260_v24, 16  ;;  %v3749_v48 = vshrl.u32 %v7260_v24, 16  ;;  %v5323_v31 = vld [vmem:[%s6393_s24 + $0x60] sm:$0xf] }
  0xd1   : > { %v3707_v5 = vshll.u32 %v7246_v33, 16  ;;  %v4997_v54 = vrot.slane %v7265_v61, 9  ;;  %v8148_v23 = vcombine.low %v7054_v34, %v7070_v4  ;;  %v7294_v29 = vcombine.low %v3676_v37, %v3686_v36  ;;  %v6231_v26 = vld [vmem:[%s6393_s24 + $0x9c] sm:$0xff]   ;;  %v6232_v30 = vld [vmem:[%s6393_s24 + $0xa8] sm:$0xff]   ;;  %v6283_v36 = vld [vmem:[%s8117_s1 + $0x10] sm:$0xf] }
  0xd2   : > { %v3694_v53 = vor.u32 %v3693_v52, %v3690_v50  ;;  %v3714_v62 = vrot.slane %v3712_v27, 4  ;;  %v7305_v34 = vrot.slane %v3721_v6, 5  ;;  %v3727_v4 = vrot.slane %v3725_v9, 4  ;;  %v6284_v6 = vld [vmem:[%s6393_s24 + $0x94] sm:$0xf] }
  0xd3   : > { %v3738_v27 = vrot.slane %v3736_v25, 4  ;;  %v3741_v37 = vrot.slane %v3739_v8, 5  ;;  %v7314_v50 = vrot.slane %v3745_v43, 5  ;;  %v3751_v52 = vrot.slane %v3749_v48, 4  ;;  %v7320_v9 = vld [vmem:[%s6393_s24 + $0x64] sm:$0xf] }
  0xd4   : > { %8149 = vst [vmem:[#allocation9_spill] sm:$0xff] %v7320_v9  ;;  %v3760_v61 = vshrl.u32 %v5323_v31, 16  ;;  %v7322_v22 = vrot.slane %v3694_v53, 4  ;;  %v1339_v25 = vrot.slane %v6286_v18, 5  ;;  %v3728_v43 = vor.u32 %v3727_v4, %v7305_v34 }
  0xd5   : > { %5828 = vmatmul.mubr.msk.bf16.gmra.mrb[16].mxu0 %vm689_vm3, %v6229_v10  ;;  %v3763_v10 = vshll.u32 %v5323_v31, 16  ;;  %v3742_v31 = vor.u32 %v3741_v37, %v3738_v27  ;;  %v3752_v53 = vor.u32 %v3751_v52, %v7314_v50  ;;  %v8150_v18 = vcombine.low %v7061_v19, %v7074_v58  ;;  %v6233_v37 = vld [vmem:[%s6393_s24 + $0xb4] sm:$0xff]  }
  0xd6   : > { %5676 = vmatmul.mubr.msk.bf16.vlgmr.msra.gmra.mrb[0].mxu1 %vm689_vm3, %v8147_v38  ;;  %5831 = vmatprep.mubr.msk.bf16.mxu0 %vm689_vm3, %v6230_v21  ;;  %v3717_v21 = vrot.slane %v3715_v15, 5  ;;  %v7303_v38 = vld [vmem:[%s6393_s24 + $0x50] sm:$0x1]  ;;  %v7312_v15 = vld [vmem:[%s6393_s24 + $0x5c] sm:$0x1]  ;;  %v8151_v27 = vcombine.low %v7079_v2, %v7083_v1  ;;  %v1341_v52 = vrot.slane %v1339_v25, 4 }
  0xd7   : > { %5708 = vmatpush3.bf16.msra.mxu1 %v7050_v49  ;;  %5679 = vmatprep.mubr.msk.bf16.mxu1 %vm689_vm3, %v8148_v23  ;;  %v3704_v49 = vor.u32 %v3703_v46, %v7262_v28  ;;  %v7316_v46 = vrot.slane %v3707_v5, 5  ;;  %v1332_v23 = vrot.slane %v6284_v6, 5  ;;  %v3731_v48 = vshll.u32 %v7303_v38, 16  ;;  %v1208_v5 = vld [vmem:[%s6393_s24 + $0x9c] sm:$0xe] }
  0xd8   : > { %6174 = vmatprep.subr.msk.bf16.mxu1 %vm738_vm0, %v6283_v36  ;;  %v6285_v36 = vld [vmem:[%s6393_s24 + $0x98] sm:$0x1]  ;;  %v3718_v7 = vor.u32 %v3717_v21, %v3714_v62  ;;  %v3755_v6 = vshll.u32 %v7312_v15, 16  ;;  %v3773_v62 = vshrl.u32 %v7320_v9, 16  ;;  %v3765_v4 = vrot.slane %v3763_v10, 5 }
  0xd9   : > { %v1335_v33 = vrot.slane %v6285_v36, 5  ;;  %v3705_v8 = vrot.slane %v3704_v49, 4  ;;  %v3769_v36 = vshll.u32 %v7320_v9, 16  ;;  %v7341_v21 = vsel %vm6645_vm7, %v4997_v54, %v1332_v23  ;;  %v7352_v2 = vld [vmem:[%s6393_s24 + $0x68] sm:$0x1] }
  0xda   : > { %v3762_v49 = vrot.slane %v3760_v61, 4  ;;  %v3719_v19 = vrot.slane %v3718_v7, 4  ;;  %v4998_v58 = vrot.slane %v1208_v5, 9  ;;  %v3729_v3 = vrot.slane %v3728_v43, 4  ;;  %8152 = vst [vmem:[#allocation10_spill] sm:$0xff] %v7352_v2  ;;  %v6234_v5 = vld [vmem:[%s6393_s24 + $0xc0] sm:$0xff]  }
  0xdb   : > { %v3733_v54 = vrot.slane %v3731_v48, 5  ;;  %v3757_v63 = vrot.slane %v3755_v6, 5  ;;  %v1346_v61 = vrot.slane %v6787_v56, 5  ;;  %v3743_v10 = vrot.slane %v3742_v31, 4  ;;  %v1210_v31 = vld [vmem:[%s6393_s24 + $0xb4] sm:$0xe] }
  0xdc   : > { %v3753_v51 = vrot.slane %v3752_v53, 4  ;;  %v7354_v1 = vrot.slane %v3769_v36, 5  ;;  %v3775_v7 = vrot.slane %v3773_v62, 4  ;;  %v3700_v43 = vsel %vm6419_vm4, %v7322_v22, %v7262_v28  ;;  %v6288_v62 = vld [vmem:[%s6393_s24 + $0xb0] sm:$0x1] }
  0xdd   : > { %5832 = vmatmul.mubr.msk.bf16.gmra.mrb[20].mxu0 %vm689_vm3, %v6231_v26  ;;  %v1334_v26 = vrot.slane %v1332_v23, 4  ;;  %v1209_v23 = vld [vmem:[%s6393_s24 + $0xa8] sm:$0xe]  ;;  %v3710_v48 = vsel %vm6419_vm4, %v3705_v8, %v7316_v46  ;;  %v3766_v6 = vor.u32 %v3765_v4, %v3762_v49  ;;  %v3724_v53 = vsel %vm6419_vm4, %v3719_v19, %v7305_v34  ;;  %v5326_v46 = vld [vmem:[%s6393_s24 + $0x6c] sm:$0xf] }
  0xde   : > { %5680 = vmatmul.mubr.msk.bf16.gmra.mrb[4].mxu1 %vm689_vm3, %v8150_v18  ;;  %5835 = vmatprep.mubr.msk.bf16.mxu0 %vm689_vm3, %v6232_v30  ;;  %v6287_v18 = vld [vmem:[%s6393_s24 + $0xa4] sm:$0x1]  ;;  %v7374_v36 = vsel %vm6645_vm7, %v4998_v58, %v1339_v25  ;;  %v4999_v28 = vrot.slane %v1209_v23, 9  ;;  %v1348_v8 = vrot.slane %v1346_v61, 4  ;;  %v3779_v49 = vshll.u32 %v7352_v2, 16 }
  0xdf   : > { %5683 = vmatprep.mubr.msk.bf16.mxu1 %vm689_vm3, %v8151_v27  ;;  %v1342_v30 = vrot.slane %v6287_v18, 5  ;;  %v7366_v56 = vsel %vm6645_vm7, %v1334_v26, %v1335_v33  ;;  %v3734_v33 = vsel %vm6419_vm4, %v3729_v3, %v3733_v54  ;;  %v1349_v26 = vrot.slane %v6288_v62, 5  ;;  %v5329_v18 = vld [vmem:[%s6393_s24 + $0x78] sm:$0xf]  ;;  %v7429_v54 = vld [vmem:[%s6393_s24 + $0xbc] sm:$0x1] }
  0xe0   : > { %v3748_v34 = vsel %vm6419_vm4, %v3743_v10, %v7314_v50  ;;  %v3758_v25 = vsel %vm6419_vm4, %v3753_v51, %v3757_v63  ;;  %v3776_v4 = vor.u32 %v3775_v7, %v7354_v1  ;;  %v5000_v27 = vrot.slane %v1210_v31, 9  ;;  %v7403_v51 = vld [vmem:[%s6393_s24 + $0x70] sm:$0xf]  ;;  %v7433_v10 = vld [vmem:[%s6393_s24 + $0x7c] sm:$0xf] }
  0xe1   : > { %v7378_v22 = vsel %vm6645_vm7, %v1341_v52, %v1342_v30  ;;  %v8154_v3 = vcombine.low %v7096_v45, %v7100_v59  ;;  %v7399_v19 = vrot.slane %v3766_v6, 4  ;;  %v1353_v50 = vrot.slane %v6811_v42, 5  ;;  %8155 = vst [vmem:[#allocation12_spill] sm:$0xff] %v7403_v51  ;;  %8157 = vst [vmem:[#allocation13_spill] sm:$0xff] %v7433_v10  ;;  %v5332_v7 = vld [vmem:[%s6393_s24 + $0x84] sm:$0xf] }
  0xe2   : > { %8153 = vst [vmem:[#allocation11_spill] sm:$0xff] %v7378_v22  ;;  %v3784_v63 = vshrl.u32 %v5326_v46, 16  ;;  %v8156_v45 = vcombine.low %v7104_v47, %v7131_v41  ;;  %v7411_v58 = vcombine.low %v3724_v53, %v3734_v33  ;;  %v7417_v42 = vsel %vm6645_vm7, %v4999_v28, %v1346_v61  ;;  %v6235_v61 = vld [vmem:[%s6393_s24 + $0xcc] sm:$0xff]   ;;  %v7445_v31 = vld [vmem:[%s6393_s24 + $0x88] sm:$0xf] }
  0xe3   : > { %v7420_v30 = vcombine.low %v3748_v34, %v3758_v25  ;;  %v7424_v47 = vsel %vm6645_vm7, %v1348_v8, %v1349_v26  ;;  %v7426_v41 = vrot.slane %v3779_v49, 5  ;;  %v3793_v6 = vshll.u32 %v7403_v51, 16  ;;  %8158 = vst [vmem:[#allocation14_spill] sm:$0xff] %v7445_v31  ;;  %v5335_v62 = vld [vmem:[%s6393_s24 + $0x90] sm:$0xf] }
  0xe4   : > { %v7451_v28 = vrot.slane %v1353_v50, 4  ;;  %v7453_v33 = vrot.slane %v3784_v63, 4  ;;  %v3797_v8 = vshrl.u32 %v7403_v51, 16  ;;  %v3808_v26 = vshrl.u32 %v5329_v18, 16  ;;  %v7460_v25 = vld [vmem:[%s6393_s24 + $0x94] sm:$0xf] }
  0xe5   : > { %5836 = vmatmul.mubr.msk.bf16.gmra.mrb[24].mxu0 %vm689_vm3, %v6233_v37  ;;  %v7397_v37 = vcombine.low %v3700_v43, %v3710_v48  ;;  %v7441_v43 = vsel %vm6645_vm7, %v5000_v27, %v1353_v50  ;;  %v3787_v48 = vshll.u32 %v5326_v46, 16  ;;  %v3811_v49 = vshll.u32 %v5329_v18, 16  ;;  %8159 = vst [vmem:[#allocation15_spill] sm:$0xff] %v7460_v25  ;;  %v7498_v2 = vld [vmem:[%s6393_s24 + $0x8c] sm:$0x1] }
  0xe6   : > { %5684 = vmatmul.mubr.msk.bf16.gmra.mrb[8].mxu1 %vm689_vm3, %v8154_v3  ;;  %5839 = vmatprep.mubr.msk.bf16.mxu0 %vm689_vm3, %v6234_v5  ;;  %v7437_v5 = vrot.slane %v3776_v4, 4  ;;  %v3817_v46 = vshll.u32 %v7433_v10, 16  ;;  %v3821_v34 = vshrl.u32 %v7433_v10, 16  ;;  %v3832_v4 = vshrl.u32 %v5332_v7, 16 }
  0xe7   : > { %5687 = vmatprep.mubr.msk.bf16.mxu1 %vm689_vm3, %v8156_v45  ;;  %v3835_v27 = vshll.u32 %v5332_v7, 16  ;;  %v3841_v3 = vshll.u32 %v7445_v31, 16  ;;  %v3845_v50 = vshrl.u32 %v7445_v31, 16  ;;  %v7470_v45 = vld [vmem:[%s6393_s24 + $0x74] sm:$0x1]  ;;  %v3789_v18 = vrot.slane %v3787_v48, 5 }
  0xe8   : > { %v3856_v52 = vshrl.u32 %v5335_v62, 16  ;;  %v3859_v53 = vshll.u32 %v5335_v62, 16  ;;  %v8160_v7 = vcombine.low %v7115_v60, %v7140_v44  ;;  %v3799_v59 = vrot.slane %v3797_v8, 4  ;;  %v5338_v48 = vld [vmem:[%s6393_s24 + $0x9c] sm:$0xf] }
  0xe9   : > { %v3865_v63 = vshll.u32 %v7460_v25, 16  ;;  %v3869_v23 = vshrl.u32 %v7460_v25, 16  ;;  %v8161_v62 = vcombine.low %v7155_v17, %v7159_v57  ;;  %v7488_v44 = vld [vmem:[%s6393_s24 + $0x80] sm:$0x1]  ;;  %v3810_v60 = vrot.slane %v3808_v26, 4 }
  0xea   : > { %8162 = vst [vmem:[#allocation16_spill] sm:$0xff] %v7488_v44  ;;  %v3834_v31 = vrot.slane %v3832_v4, 4  ;;  %v3837_v8 = vrot.slane %v3835_v27, 5  ;;  %v7492_v10 = vrot.slane %v3841_v3, 5  ;;  %v3847_v51 = vrot.slane %v3845_v50, 4 }
  0xeb   : > { %v7495_v25 = vld [vmem:[%s6393_s24 + $0xa0] sm:$0xf]  ;;  %v3858_v17 = vrot.slane %v3856_v52, 4  ;;  %v3861_v57 = vrot.slane %v3859_v53, 5  ;;  %v3883_v9 = vshll.u32 %v5338_v48, 16  ;;  %v3790_v26 = vor.u32 %v3789_v18, %v7453_v33 }
  0xec   : > { %v3827_v27 = vshll.u32 %v7488_v44, 16  ;;  %v7507_v3 = vld [vmem:[%s6393_s24 + $0x98] sm:$0x1]  ;;  %v3889_v50 = vshll.u32 %v7495_v25, 16  ;;  %v3893_v52 = vshrl.u32 %v7495_v25, 16  ;;  %v3838_v22 = vor.u32 %v3837_v8, %v3834_v31 }
  0xed   : > { %5840 = vmatmul.mubr.msk.bf16.gmra.mrb[28].mxu0 %vm689_vm3, %v6235_v61  ;;  %v7478_v61 = vrot.slane %v3793_v6, 5  ;;  %v3823_v6 = vrot.slane %v3821_v34, 4  ;;  %v3871_v34 = vrot.slane %v3869_v23, 4  ;;  %v3851_v33 = vshll.u32 %v7498_v2, 16 }
  0xee   : > { %5688 = vmatmul.mubr.msk.bf16.gmra.mrb[12].mxu1 %vm689_vm3, %v8160_v7  ;;  %5845 = vmatprep.mubr.msk.bf16.mxu0 %vm689_vm3, %v7220_v20  ;;  %v3813_v7 = vrot.slane %v3811_v49, 5  ;;  %v7490_v20 = vrot.slane %v3817_v46, 5  ;;  %v3803_v49 = vshll.u32 %v7470_v45, 16  ;;  %v7502_v46 = vrot.slane %v3865_v63, 5 }
  0xef   : > { %5691 = vmatprep.mubr.msk.bf16.mxu1 %vm689_vm3, %v8161_v62  ;;  %v3880_v62 = vshrl.u32 %v5338_v48, 16  ;;  %v3800_v4 = vor.u32 %v3799_v59, %v7478_v61  ;;  %v3848_v23 = vor.u32 %v3847_v51, %v7492_v10  ;;  %v3862_v59 = vor.u32 %v3861_v57, %v3858_v17  ;;  %v7540_v57 = vld [vmem:[%s6393_s24 + $0xa4] sm:$0x1] }
  0xf0   : > { %v3814_v53 = vor.u32 %v3813_v7, %v3810_v60  ;;  %v3824_v48 = vor.u32 %v3823_v6, %v7490_v20  ;;  %v3885_v18 = vrot.slane %v3883_v9, 5  ;;  %v8163_v44 = vcombine.low %v7167_v11, %v7171_v40 }
  0xf1   : > { %v3882_v63 = vrot.slane %v3880_v62, 4  ;;  %v8164_v31 = vrot.slane %v7429_v54, 5  ;;  %v3805_v51 = vrot.slane %v3803_v49, 5  ;;  %v3872_v60 = vor.u32 %v3871_v34, %v7502_v46  ;;  %v7543_v34 = vld [vmem:[%s6393_s24 + $0xac] sm:$0xf] }
  0xf2   : > { %v3875_v9 = vshll.u32 %v7507_v3, 16  ;;  %v8165_v11 = vcombine.low %v7239_v39, %v7243_v55  ;;  %v3791_v40 = vrot.slane %v3790_v26, 4  ;;  %v7536_v54 = vrot.slane %v3889_v50, 5 }
  0xf3   : > { %v3815_v7 = vrot.slane %v3814_v53, 4  ;;  %v3825_v6 = vrot.slane %v3824_v48, 4  ;;  %v3829_v8 = vrot.slane %v3827_v27, 5  ;;  %v3853_v17 = vrot.slane %v3851_v33, 5  ;;  %v7553_v48 = vld [vmem:[%s6393_s24 + $0xb0] sm:$0x1] }
  0xf4   : > { %v3839_v39 = vrot.slane %v3838_v22, 4  ;;  %v3849_v55 = vrot.slane %v3848_v23, 4  ;;  %v3863_v62 = vrot.slane %v3862_v59, 4  ;;  %v3886_v49 = vor.u32 %v3885_v18, %v3882_v63 }
  0xf5   : > { %5846 = vmatmul.mubr.msk.bf16.vlgmr.msra.gmra.mrb[0].mxu0 %vm689_vm3, %v7283_v16  ;;  %v7526_v16 = vsel %vm6645_vm7, %v7451_v28, %v8164_v31  ;;  %v3895_v28 = vrot.slane %v3893_v52, 4  ;;  %v3877_v26 = vrot.slane %v3875_v9, 5  ;;  %v3796_v52 = vsel %vm6419_vm4, %v3791_v40, %v7478_v61 }
  0xf6   : > { %5692 = vmatmul.mubr.msk.bf16.gmra.mrb[16].mxu1 %vm689_vm3, %v8163_v44  ;;  %5878 = vmatpush3.bf16.msra.mxu0 %v7224_v14  ;;  %v3801_v14 = vrot.slane %v3800_v4, 4  ;;  %v5341_v44 = vld [vmem:[%s6393_s24 + $0xa8] sm:$0xf]  ;;  %v3899_v22 = vshll.u32 %v7540_v57, 16  ;;  %v3820_v33 = vsel %vm6419_vm4, %v3815_v7, %v7490_v20  ;;  %v3830_v23 = vsel %vm6419_vm4, %v3825_v6, %v3829_v8 }
  0xf7   : > { %5695 = vmatprep.mubr.msk.bf16.mxu1 %vm689_vm3, %v8165_v11  ;;  %5849 = vmatprep.mubr.msk.bf16.mxu0 %vm689_vm3, %v7294_v29  ;;  %v3873_v29 = vrot.slane %v3872_v60, 4  ;;  %v3904_v4 = vshrl.u32 %v5341_v44, 16  ;;  %v3907_v50 = vshll.u32 %v5341_v44, 16  ;;  %v3896_v53 = vor.u32 %v3895_v28, %v7536_v54  ;;  %v5389_v11 = vld [vmem:[%s6393_s24 + $0x48] sm:$0xe] }
  0xf8   : > { %v3806_v27 = vsel %vm6419_vm4, %v3801_v14, %v3805_v51  ;;  %v3913_v59 = vshll.u32 %v7543_v34, 16  ;;  %v3917_v61 = vshrl.u32 %v7543_v34, 16  ;;  %v3844_v63 = vsel %vm6419_vm4, %v3839_v39, %v7492_v10  ;;  %v7618_v39 = vld [vmem:[%s6393_s24 + $0xb8] sm:$0xf] }
  0xf9   : > { %v3854_v18 = vsel %vm6419_vm4, %v3849_v55, %v3853_v17  ;;  %v3868_v20 = vsel %vm6419_vm4, %v3863_v62, %v7502_v46  ;;  %v3887_v31 = vrot.slane %v3886_v49, 4  ;;  %v8166_v51 = vcombine.low %v7256_v12, %v7271_v35 }
  0xfa   : > { %v3906_v10 = vrot.slane %v3904_v4, 4  ;;  %v3909_v60 = vrot.slane %v3907_v50, 5  ;;  %v3923_v9 = vshll.u32 %v7553_v48, 16  ;;  %v8167_v46 = vcombine.low %v7341_v21, %v7366_v56  ;;  %v5344_v21 = vld [vmem:[%s6393_s24 + $0xb4] sm:$0xf] }
  0xfb   : > { %v5015_v12 = vcombine.low %v7417_v42, %v7424_v47  ;;  %v8168_v35 = vsel %vm6419_vm4, %v7437_v5, %v7426_v41  ;;  %v3897_v14 = vrot.slane %v3896_v53, 4  ;;  %v3901_v28 = vrot.slane %v3899_v22, 5  ;;  %v5391_v4 = vld [vmem:[%s6393_s24 + $0x60] sm:$0xe]  ;;  %v5392_v53 = vld [vmem:[%s6393_s24 + $0x6c] sm:$0xe] }
  0xfc   : > { %v5016_v56 = vcombine.low %v7441_v43, %v7526_v16  ;;  %v7601_v44 = vcombine.low %v3796_v52, %v3806_v27  ;;  %v7603_v42 = vrot.slane %v3913_v59, 5  ;;  %v3919_v47 = vrot.slane %v3917_v61, 4  ;;  %v8177_v16 = vld [vmem:[#allocation4_spill] sm:$0xff] }
  0xfd   : > { %5850 = vmatmul.mubr.msk.bf16.gmra.mrb[4].mxu0 %vm689_vm3, %v7397_v37  ;;  %v3878_v37 = vsel %vm6419_vm4, %v3873_v29, %v3877_v26  ;;  %v7605_v41 = vcombine.low %v3820_v33, %v3830_v23  ;;  %v7607_v5 = vcombine.low %v3844_v63, %v3854_v18  ;;  %v3892_v6 = vsel %vm6419_vm4, %v3887_v31, %v7536_v54  ;;  %v8170_v23 = vld [vmem:[#allocation11_spill] sm:$0xff]  ;;  %v5347_v63 = vld [vmem:[%s6393_s24 + $0xc0] sm:$0xf]  ;;  %v8172_v18 = vld [vmem:[#allocation9_spill] sm:$0xff] }
  0xfe   : > { %5696 = vmatmul.mubr.msk.bf16.gmra.mrb[20].mxu1 %vm689_vm3, %v8166_v51  ;;  %5853 = vmatprep.mubr.msk.bf16.mxu0 %vm689_vm3, %v7411_v58  ;;  %v8169_v58 = vsel %vm6419_vm4, %v7399_v19, %v7354_v1  ;;  %v7609_v7 = vcombine.low %v3868_v20, %v3878_v37  ;;  %v5405_v1 = vrot.slane %v5389_v11, 9  ;;  %v5390_v19 = vld [vmem:[%s6393_s24 + $0x54] sm:$0xe]  ;;  %v3910_v8 = vor.u32 %v3909_v60, %v3906_v10  ;;  %v8173_v31 = vld [vmem:[#allocation10_spill] sm:$0xff] }
  0xff   : > { %5699 = vmatprep.mubr.msk.bf16.mxu1 %vm689_vm3, %v8167_v46  ;;  %v5359_v40 = vcombine.low %v8169_v58, %v8168_v35  ;;  %v7615_v17 = vrot.slane %v3923_v9, 5  ;;  %v3928_v55 = vshrl.u32 %v5344_v21, 16  ;;  %v3902_v62 = vsel %vm6419_vm4, %v3897_v14, %v3901_v28  ;;  %v8174_v9 = vld [vmem:[#allocation12_spill] sm:$0xff]  ;;  %v7667_v35 = vld [vmem:[%s6393_s24 + $0xbc] sm:$0x1] }
 0x100   : > { %v3931_v49 = vshll.u32 %v5344_v21, 16  ;;  %v4386_v29 = vrot.slane %v7249_v0, 5  ;;  %v4389_v26 = vrot.slane %v7303_v38, 5  ;;  %v3920_v50 = vor.u32 %v3919_v47, %v7603_v42  ;;  %v7670_v58 = vld [vmem:[%s6393_s24 + $0xc4] sm:$0xf] }
 0x101   : > { %v5406_v52 = vrot.slane %v5390_v19, 9  ;;  %v4393_v54 = vrot.slane %v7260_v24, 5  ;;  %v4396_v27 = vrot.slane %v7312_v15, 5  ;;  %v3937_v22 = vshll.u32 %v7618_v39, 16  ;;  %v5393_v19 = vld [vmem:[%s6393_s24 + $0x78] sm:$0xe] }
 0x102   : > { %v3941_v33 = vshrl.u32 %v7618_v39, 16  ;;  %v7635_v0 = vsel %vm6645_vm7, %v5405_v1, %v4386_v29  ;;  %v4388_v38 = vrot.slane %v4386_v29, 4  ;;  %v8171_v59 = vcombine.low %v7374_v36, %v8170_v23  ;;  %v8175_v23 = vld [vmem:[#allocation13_spill] sm:$0xff] }
 0x103   : > { %v7642_v24 = vcombine.low %v3892_v6, %v3902_v62  ;;  %v7646_v15 = vsel %vm6645_vm7, %v5406_v52, %v4393_v54  ;;  %v5407_v61 = vrot.slane %v5391_v4, 9  ;;  %v4400_v20 = vrot.slane %v8172_v18, 5  ;;  %v6236_v6 = vld [vmem:[%s6393_s24 + $0xc] sm:$0xff]  }
 0x104   : > { %v7652_v36 = vsel %vm6645_vm7, %v4388_v38, %v4389_v26  ;;  %v4403_v51 = vrot.slane %v8173_v31, 5  ;;  %v5408_v37 = vrot.slane %v5392_v53, 9  ;;  %v4407_v11 = vrot.slane %v8174_v9, 5 }
 0x105   : > { %5854 = vmatmul.mubr.msk.bf16.gmra.mrb[8].mxu0 %vm689_vm3, %v7420_v30  ;;  %v4395_v30 = vrot.slane %v4393_v54, 4  ;;  %v5421_v10 = vcombine.low %v7635_v0, %v7652_v36  ;;  %v4410_v46 = vrot.slane %v7470_v45, 5  ;;  %v7676_v14 = vsel %vm6645_vm7, %v5407_v61, %v4400_v20 }
 0x106   : > { %5700 = vmatmul.mubr.msk.bf16.gmra.mrb[24].mxu1 %vm689_vm3, %v8171_v59  ;;  %5857 = vmatprep.mubr.msk.bf16.mxu0 %vm689_vm3, %v5359_v40  ;;  %v4402_v28 = vrot.slane %v4400_v20, 4  ;;  %v7678_v21 = vrot.slane %v3928_v55, 4  ;;  %v3952_v47 = vshrl.u32 %v5347_v63, 16  ;;  %v7682_v45 = vsel %vm6645_vm7, %v5408_v37, %v4407_v11  ;;  %v5124_v55 = vld [vmem:[%s6393_s24 + $0x78] sm:$0xf]  ;;  %v8176_v59 = vld [vmem:[#allocation16_spill] sm:$0xff] }
 0x107   : > { %5703 = vmatprep.mubr.msk.bf16.mxu1 %vm689_vm3, %v5015_v12  ;;  %v7660_v60 = vsel %vm6645_vm7, %v4395_v30, %v4396_v27  ;;  %v7664_v12 = vrot.slane %v3910_v8, 4  ;;  %v4409_v1 = vrot.slane %v4407_v11, 4  ;;  %v7686_v8 = vrot.slane %v3920_v50, 4 }
 0x108   : > { %v5422_v40 = vcombine.low %v7646_v15, %v7660_v60  ;;  %v7688_v62 = vrot.slane %v3931_v49, 5  ;;  %v3955_v29 = vshll.u32 %v5347_v63, 16  ;;  %v7692_v26 = vsel %vm6645_vm7, %v4402_v28, %v4403_v51  ;;  %v8179_v28 = vld [vmem:[#allocation14_spill] sm:$0xff] }
 0x109   : > { %v7695_v4 = vrot.slane %v3937_v22, 5  ;;  %v7697_v52 = vrot.slane %v3941_v33, 4  ;;  %v5423_v54 = vcombine.low %v7676_v14, %v7692_v26  ;;  %v7703_v27 = vsel %vm6645_vm7, %v4409_v1, %v4410_v46  ;;  %v5394_v33 = vld [vmem:[%s6393_s24 + $0x84] sm:$0xe]  ;;  %v6237_v1 = vld [vmem:[%s6393_s24 + $0x18] sm:$0xff]  }
 0x10a   : > { %v3947_v49 = vshll.u32 %v7667_v35, 16  ;;  %v3961_v50 = vshll.u32 %v7670_v58, 16  ;;  %v5424_v53 = vcombine.low %v7682_v45, %v7703_v27  ;;  %v5409_v22 = vrot.slane %v5393_v19, 9  ;;  %v6299_v60 = vld [vmem:[%s6393_s24 + $0xa0] sm:$0xf] }
 0x10b   : > { %v3954_v38 = vrot.slane %v3952_v47, 4  ;;  %v4417_v30 = vrot.slane %v8176_v59, 5  ;;  %v2277_v61 = vshrl.u32 %v5124_v55, 16  ;;  %v3957_v63 = vrot.slane %v3955_v29, 5  ;;  %v5350_v29 = vld [vmem:[%s6393_s24 + $0xcc] sm:$0xf] }
 0x10c   : > { %v3965_v18 = vshrl.u32 %v7670_v58, 16  ;;  %v2280_v43 = vshll.u32 %v5124_v55, 16  ;;  %v5410_v37 = vrot.slane %v5394_v33, 9  ;;  %v3916_v9 = vsel %vm6419_vm4, %v7664_v12, %v7603_v42  ;;  %v7746_v55 = vld [vmem:[%s6393_s24 + $0xd0] sm:$0xf] }
 0x10d   : > { %5858 = vmatmul.mubr.msk.bf16.gmra.mrb[12].mxu0 %vm689_vm3, %v7601_v44  ;;  %v4414_v44 = vrot.slane %v8175_v23, 5  ;;  %v2279_v51 = vrot.slane %v2277_v61, 4  ;;  %v3934_v11 = vor.u32 %v7688_v62, %v7678_v21  ;;  %v4421_v47 = vrot.slane %v8179_v28, 5  ;;  %v6238_v21 = vld [vmem:[%s6393_s24 + $0x24] sm:$0xff]   ;;  %v6303_v27 = vld [vmem:[%s6393_s24 + $0xac] sm:$0xf] }
 0x10e   : > { %5704 = vmatmul.mubr.msk.bf16.gmra.mrb[28].mxu1 %vm689_vm3, %v5016_v56  ;;  %5861 = vmatprep.mubr.msk.bf16.mxu0 %vm689_vm3, %v7605_v41  ;;  %v8178_v56 = vld [vmem:[#allocation5_spill] sm:$0xff]  ;;  %v2282_v46 = vrot.slane %v2280_v43, 5  ;;  %v3926_v19 = vsel %vm6419_vm4, %v7686_v8, %v7615_v17  ;;  %v4424_v12 = vrot.slane %v7498_v2, 5  ;;  %v7754_v62 = vrot.slane %v3961_v50, 5  ;;  %v5395_v8 = vld [vmem:[%s6393_s24 + $0x90] sm:$0xe] }
 0x10f   : > { %5709 = vmatprep.mubr.msk.bf16.mxu1 %vm689_vm3, %v6236_v6  ;;  %v2299_v41 = vsel %vm6419_vm4, %v8178_v56, %v8177_v16  ;;  %v7728_v20 = vsel %vm6645_vm7, %v5409_v22, %v4414_v44  ;;  %v4416_v31 = vrot.slane %v4414_v44, 4  ;;  %v3944_v6 = vor.u32 %v7697_v52, %v7695_v4  ;;  %v7760_v52 = vld [vmem:[%s6393_s24 + $0xc8] sm:$0x1]  ;;  %v8181_v16 = vld [vmem:[#allocation2_spill] sm:$0xff] }
 0x110   : > { %v3967_v22 = vrot.slane %v3965_v18, 4  ;;  %v2283_v17 = vor.u32 %v2282_v46, %v2279_v51  ;;  %v3949_v23 = vrot.slane %v3947_v49, 5  ;;  %v3958_v44 = vor.u32 %v3957_v63, %v3954_v38  ;;  %v8182_v51 = vld [vmem:[#allocation3_spill] sm:$0xff] }
 0x111   : > { %v7750_v42 = vsel %vm6645_vm7, %v4416_v31, %v4417_v30  ;;  %v7764_v59 = vsel %vm6645_vm7, %v5410_v37, %v4421_v47  ;;  %v4423_v30 = vrot.slane %v4421_v47, 4  ;;  %v3976_v2 = vshrl.u32 %v5350_v29, 16 }
 0x112   : > { %v5425_v33 = vcombine.low %v7728_v20, %v7750_v42  ;;  %v3979_v50 = vshll.u32 %v5350_v29, 16  ;;  %v3985_v61 = vshll.u32 %v7746_v55, 16  ;;  %v2284_v18 = vrot.slane %v2283_v17, 4  ;;  %v6239_v29 = vld [vmem:[%s6393_s24 + $0x30] sm:$0xff]  }
 0x113   : > { %v3989_v49 = vshrl.u32 %v7746_v55, 16  ;;  %v7775_v38 = vsel %vm6645_vm7, %v4423_v30, %v4424_v12  ;;  %v5411_v63 = vrot.slane %v5395_v8, 9  ;;  %v3968_v56 = vor.u32 %v3967_v22, %v7754_v62 }
 0x114   : > { %v3971_v31 = vshll.u32 %v7760_v52, 16  ;;  %v5426_v37 = vcombine.low %v7764_v59, %v7775_v38  ;;  %v5365_v46 = vcombine.low %v3916_v9, %v3926_v19  ;;  %v3935_v28 = vrot.slane %v3934_v11, 4  ;;  %v5396_v11 = vld [vmem:[%s6393_s24 + $0x9c] sm:$0xe] }
 0x115   : > { %5862 = vmatmul.mubr.msk.bf16.gmra.mrb[16].mxu0 %vm689_vm3, %v7607_v5  ;;  %v8180_v5 = vld [vmem:[#allocation15_spill] sm:$0xff]  ;;  %v3945_v47 = vrot.slane %v3944_v6, 4  ;;  %v3959_v12 = vrot.slane %v3958_v44, 4  ;;  %v4431_v8 = vrot.slane %v7507_v3, 5  ;;  %v3978_v30 = vrot.slane %v3976_v2, 4  ;;  %v6240_v19 = vld [vmem:[%s6393_s24 + $0x3c] sm:$0xff]  }
 0x116   : > { %5710 = vmatmul.mubr.msk.bf16.vlgmr.msra.gmra.mrb[0].mxu1 %vm689_vm3, %v6237_v1  ;;  %5865 = vmatprep.mubr.msk.bf16.mxu0 %vm689_vm3, %v7609_v7  ;;  %v4428_v43 = vrot.slane %v8180_v5, 5  ;;  %v2289_v7 = vsel %vm6419_vm4, %v2284_v18, %v8182_v51  ;;  %v3981_v18 = vrot.slane %v3979_v50, 5  ;;  %v7798_v5 = vrot.slane %v3985_v61, 5 }
 0x117   : > { %5912 = vmatpush3.bf16.msra.mxu1 %v8181_v16  ;;  %5713 = vmatprep.mubr.msk.bf16.mxu1 %vm689_vm3, %v6238_v21  ;;  %v7787_v1 = vcombine.low %v2289_v7, %v2299_v41  ;;  %v7791_v21 = vld [vmem:[%s6393_s24 + $0xd4] sm:$0x1]  ;;  %v3991_v9 = vrot.slane %v3989_v49, 4  ;;  %v3969_v41 = vrot.slane %v3968_v56, 4  ;;  %v3973_v6 = vrot.slane %v3971_v31, 5 }
 0x118   : > { %v7795_v22 = vsel %vm6645_vm7, %v5411_v63, %v4428_v43  ;;  %v4430_v17 = vrot.slane %v4428_v43, 4  ;;  %v3940_v63 = vsel %vm6419_vm4, %v3935_v28, %v7695_v4  ;;  %v3950_v2 = vsel %vm6419_vm4, %v3945_v47, %v3949_v23  ;;  %v6290_v16 = vld [vmem:[%s6393_s24 + $0x1c] sm:$0xf]  ;;  %v5397_v28 = vld [vmem:[%s6393_s24 + $0xa8] sm:$0xe] }
 0x119   : > { %v3995_v50 = vshll.u32 %v7791_v21, 16  ;;  %v5412_v61 = vrot.slane %v5396_v11, 9  ;;  %v4435_v49 = vrot.slane %v7495_v25, 5  ;;  %v3964_v4 = vsel %vm6419_vm4, %v3959_v12, %v7754_v62  ;;  %v5385_v62 = vld [vmem:[%s6393_s24 + $0x18] sm:$0xe]  ;;  %v6241_v47 = vld [vmem:[%s6393_s24 + $0x48] sm:$0xff]  }
 0x11a   : > { %v7804_v44 = vsel %vm6645_vm7, %v4430_v17, %v4431_v8  ;;  %v3992_v43 = vor.u32 %v3991_v9, %v7798_v5  ;;  %v4438_v23 = vrot.slane %v7540_v57, 5  ;;  %v3974_v25 = vsel %vm6419_vm4, %v3969_v41, %v3973_v6  ;;  %v6291_v11 = vld [vmem:[%s6393_s24 + $0x20] sm:$0x1] }
 0x11b   : > { %v5427_v3 = vcombine.low %v7795_v22, %v7804_v44  ;;  %v4358_v56 = vrot.slane %v6290_v16, 5  ;;  %v7830_v31 = vsel %vm6645_vm7, %v5412_v61, %v4435_v49  ;;  %v4437_v51 = vrot.slane %v4435_v49, 4  ;;  %v5398_v49 = vld [vmem:[%s6393_s24 + $0xb4] sm:$0xe] }
 0x11c   : > { %v5366_v7 = vcombine.low %v3940_v63, %v3950_v2  ;;  %v3993_v17 = vrot.slane %v3992_v43, 4  ;;  %v5413_v41 = vrot.slane %v5397_v28, 9  ;;  %v4442_v6 = vrot.slane %v7543_v34, 5  ;;  %v5386_v2 = vld [vmem:[%s6393_s24 + $0x24] sm:$0xe] }
 0x11d   : > { %5866 = vmatmul.mubr.msk.bf16.gmra.mrb[20].mxu0 %vm689_vm3, %v7642_v24  ;;  %v3982_v24 = vor.u32 %v3981_v18, %v3978_v30  ;;  %v7835_v57 = vsel %vm6645_vm7, %v4437_v51, %v4438_v23  ;;  %v6242_v30 = vld [vmem:[%s6393_s24 + $0x54] sm:$0xff]   ;;  %v5401_v18 = vrot.slane %v5385_v62, 9  ;;  %v4360_v9 = vrot.slane %v4358_v56, 4  ;;  %v6294_v28 = vld [vmem:[%s6393_s24 + $0x2c] sm:$0x1] }
 0x11e   : > { %5714 = vmatmul.mubr.msk.bf16.gmra.mrb[4].mxu1 %vm689_vm3, %v6239_v29  ;;  %5869 = vmatprep.mubr.msk.bf16.mxu0 %vm689_vm3, %v5365_v46  ;;  %v3997_v46 = vrot.slane %v3995_v50, 5  ;;  %v5367_v29 = vcombine.low %v3964_v4, %v3974_v25  ;;  %v5428_v8 = vcombine.low %v7830_v31, %v7835_v57  ;;  %v4445_v63 = vrot.slane %v7553_v48, 5  ;;  %v6292_v50 = vld [vmem:[%s6393_s24 + $0x28] sm:$0xf]  ;;  %v5387_v25 = vld [vmem:[%s6393_s24 + $0x30] sm:$0xe] }
 0x11f   : > { %5717 = vmatprep.mubr.msk.bf16.mxu1 %vm689_vm3, %v6240_v19  ;;  %v3983_v12 = vrot.slane %v3982_v24, 4  ;;  %v4361_v19 = vrot.slane %v6291_v11, 5  ;;  %v4365_v61 = vrot.slane %v6292_v50, 5  ;;  %v7858_v48 = vsel %vm6645_vm7, %v5413_v41, %v4442_v6  ;;  %v6244_v11 = vld [vmem:[%s6393_s24 + $0x6c] sm:$0xff]   ;;  %v8183_v41 = vld [vmem:[#allocation6_spill] sm:$0xff] }
 0x120   : > { %v3998_v34 = vsel %vm6419_vm4, %v3993_v17, %v3997_v46  ;;  %v4444_v24 = vrot.slane %v4442_v6, 4  ;;  %v4359_v43 = vsel %vm6645_vm7, %v5401_v18, %v4358_v56  ;;  %v5402_v51 = vrot.slane %v5386_v2, 9  ;;  %v5399_v50 = vld [vmem:[%s6393_s24 + $0xc0] sm:$0xe]  ;;  %v6308_v31 = vld [vmem:[%s6393_s24 + $0xc8] sm:$0x1] }
 0x121   : > { %v3988_v4 = vsel %vm6419_vm4, %v3983_v12, %v7798_v5  ;;  %v4362_v23 = vsel %vm6645_vm7, %v4360_v9, %v4361_v19  ;;  %v6293_v5 = vld [vmem:[%s6393_s24 + $0x34] sm:$0xf]  ;;  %v6243_v12 = vld [vmem:[%s6393_s24 + $0x60] sm:$0xff]   ;;  %v5403_v18 = vrot.slane %v5387_v25, 9  ;;  %v4452_v9 = vrot.slane %v7667_v35, 5 }
 0x122   : > { %v4372_v16 = vrot.slane %v6293_v5, 5  ;;  %v7869_v62 = vsel %vm6645_vm7, %v4444_v24, %v4445_v63  ;;  %v5368_v46 = vcombine.low %v3988_v4, %v3998_v34  ;;  %v5417_v17 = vcombine.low %v4359_v43, %v4362_v23  ;;  %v5388_v24 = vld [vmem:[%s6393_s24 + $0x3c] sm:$0xe] }
 0x123   : > { %v5429_v56 = vcombine.low %v7858_v48, %v7869_v62  ;;  %v4375_v6 = vrot.slane %v8183_v41, 5  ;;  %v4366_v35 = vsel %vm6645_vm7, %v5402_v51, %v4365_v61  ;;  %v5415_v5 = vrot.slane %v5399_v50, 9 }
 0x124   : > { %v4374_v19 = vrot.slane %v4372_v16, 4  ;;  %v4373_v23 = vsel %vm6645_vm7, %v5403_v18, %v4372_v16  ;;  %v4459_v51 = vrot.slane %v7760_v52, 5  ;;  %v2440_v57 = vshll.u32 %v6308_v31, 16 }
 0x125   : > { %5870 = vmatmul.mubr.msk.bf16.gmra.mrb[24].mxu0 %vm689_vm3, %v5366_v7  ;;  %v5414_v7 = vrot.slane %v5398_v49, 9 }
 0x126   : > { %5718 = vmatmul.mubr.msk.bf16.gmra.mrb[8].mxu1 %vm689_vm3, %v6241_v47  ;;  %5873 = vmatprep.mubr.msk.bf16.mxu0 %vm689_vm3, %v5367_v29  ;;  %v4368_v47 = vrot.slane %v6294_v28, 5  ;;  %v4449_v29 = vrot.slane %v7618_v39, 5  ;;  %v8184_v39 = vld [vmem:[#allocation7_spill] sm:$0xff]  ;;  %v4376_v25 = vsel %vm6645_vm7, %v4374_v19, %v4375_v6  ;;  %v5404_v28 = vrot.slane %v5388_v24, 9 }
 0x127   : > { %5721 = vmatprep.mubr.msk.bf16.mxu1 %vm689_vm3, %v6242_v30  ;;  %v4367_v30 = vrot.slane %v4365_v61, 4  ;;  %v4379_v49 = vrot.slane %v8184_v39, 5  ;;  %v4456_v61 = vrot.slane %v7670_v58, 5  ;;  %v6295_v39 = vld [vmem:[%s6393_s24 + $0x70] sm:$0xf]  ;;  %v4463_v24 = vrot.slane %v7746_v55, 5 }
 0x128   : > { %v7881_v63 = vsel %vm6645_vm7, %v5414_v7, %v4449_v29  ;;  %v4451_v2 = vrot.slane %v4449_v29, 4  ;;  %v5121_v7 = vld [vmem:[%s6393_s24 + $0x6c] sm:$0xf]  ;;  %v8185_v29 = vld [vmem:[#allocation8_spill] sm:$0xff] }
 0x129   : > { %v4369_v34 = vsel %vm6645_vm7, %v4367_v30, %v4368_v47  ;;  %v4381_v47 = vrot.slane %v4379_v49, 4  ;;  %v6245_v30 = vld [vmem:[%s6393_s24 + $0x78] sm:$0xff]   ;;  %v7912_v16 = vsel %vm6645_vm7, %v5415_v5, %v4456_v61  ;;  %v4458_v18 = vrot.slane %v4456_v61, 4 }
 0x12a   : > { %v7888_v4 = vsel %vm6645_vm7, %v4451_v2, %v4452_v9  ;;  %v5419_v9 = vcombine.low %v4373_v23, %v4376_v25  ;;  %v2253_v19 = vshrl.u32 %v5121_v7, 16  ;;  %v2256_v41 = vshll.u32 %v5121_v7, 16 }
 0x12b   : > { %v5430_v43 = vcombine.low %v7881_v63, %v7888_v4  ;;  %v7917_v58 = vsel %vm6645_vm7, %v4458_v18, %v4459_v51  ;;  %v4380_v6 = vsel %vm6645_vm7, %v5404_v28, %v4379_v49  ;;  %v4466_v49 = vrot.slane %v7791_v21, 5  ;;  %v6247_v51 = vld [vmem:[%s6393_s24 + $0x90] sm:$0xff]   ;;  %v6248_v21 = vld [vmem:[%s6393_s24 + $0x9c] sm:$0xff]  }
 0x12c   : > { %v5431_v50 = vcombine.low %v7912_v16, %v7917_v58  ;;  %v2255_v23 = vrot.slane %v2253_v19, 4  ;;  %v2258_v25 = vrot.slane %v2256_v41, 5  ;;  %v4465_v7 = vrot.slane %v4463_v24, 4 }
 0x12d   : > { %5874 = vmatmul.mubr.msk.bf16.gmra.mrb[28].mxu0 %vm689_vm3, %v5368_v46  ;;  %v5418_v46 = vcombine.low %v4366_v35, %v4369_v34  ;;  %v2262_v35 = vshll.u32 %v6295_v39, 16  ;;  %v2266_v34 = vshrl.u32 %v6295_v39, 16 }
 0x12e   : > { %5722 = vmatmul.mubr.msk.bf16.gmra.mrb[12].mxu1 %vm689_vm3, %v6243_v12  ;;  %5879 = vmatprep.mubr.msk.bf16.mxu0 %vm689_vm3, %v5417_v17  ;;  %v4382_v12 = vrot.slane %v8185_v29, 5  ;;  %v5400_v17 = vld [vmem:[%s6393_s24 + $0xcc] sm:$0xe]  ;;  %v7939_v55 = vsel %vm6645_vm7, %v4465_v7, %v4466_v49 }
 0x12f   : > { %5725 = vmatprep.mubr.msk.bf16.mxu1 %vm689_vm3, %v6244_v11  ;;  %v6246_v11 = vld [vmem:[%s6393_s24 + $0x84] sm:$0xff]   ;;  %v5416_v52 = vrot.slane %v5400_v17, 9  ;;  %v2268_v28 = vrot.slane %v2266_v34, 4  ;;  %v6296_v17 = vld [vmem:[%s6393_s24 + $0x74] sm:$0x1] }
 0x130   : > { %v4383_v2 = vsel %vm6645_vm7, %v4381_v47, %v4382_v12  ;;  %v5127_v47 = vld [vmem:[%s6393_s24 + $0x84] sm:$0xf]  ;;  %v2259_v12 = vor.u32 %v2258_v25, %v2255_v23  ;;  %v6250_v34 = vld [vmem:[%s6393_s24 + $0xb4] sm:$0xff]  }
 0x131   : > { %v7934_v5 = vsel %vm6645_vm7, %v5416_v52, %v4463_v24  ;;  %v5420_v61 = vcombine.low %v4380_v6, %v4383_v2  ;;  %v2304_v18 = vshll.u32 %v5127_v47, 16  ;;  %v5130_v6 = vld [vmem:[%s6393_s24 + $0x90] sm:$0xf]  ;;  %v6249_v2 = vld [vmem:[%s6393_s24 + $0xa8] sm:$0xff]  }
 0x132   : > { %v5432_v29 = vcombine.low %v7934_v5, %v7939_v55  ;;  %v2260_v52 = vrot.slane %v2259_v12, 4  ;;  %v2325_v23 = vshrl.u32 %v5130_v6, 16  ;;  %v2328_v25 = vshll.u32 %v5130_v6, 16 }
 0x133   : > { %v2358_v12 = vshll.u32 %v6299_v60, 16 }
 0x134   : > { %v2330_v14 = vrot.slane %v2328_v25, 5  ;;  %v6302_v25 = vld [vmem:[%s6393_s24 + $0xa4] sm:$0x1] }
 0x135   : > { %5880 = vmatmul.mubr.msk.bf16.vlgmr.msra.gmra.mrb[0].mxu0 %vm689_vm3, %v5418_v46  ;;  %v2264_v46 = vrot.slane %v2262_v35, 5  ;;  %v5133_v35 = vld [vmem:[%s6393_s24 + $0x9c] sm:$0xf]  ;;  %v7981_v6 = vrot.slane %v2358_v12, 5 }
 0x136   : > { %5726 = vmatmul.mubr.msk.bf16.gmra.mrb[16].mxu1 %vm689_vm3, %v6245_v30  ;;  %5883 = vmatprep.mubr.msk.bf16.mxu0 %vm689_vm3, %v5419_v9  ;;  %v2272_v30 = vshll.u32 %v6296_v17, 16  ;;  %v2301_v9 = vshrl.u32 %v5127_v47, 16  ;;  %v2352_v47 = vshll.u32 %v5133_v35, 16  ;;  %v6300_v17 = vld [vmem:[%s6393_s24 + $0x8c] sm:$0x1] }
 0x137   : > { %5729 = vmatprep.mubr.msk.bf16.mxu1 %vm689_vm3, %v6246_v11  ;;  %v2269_v13 = vor.u32 %v2268_v28, %v2264_v46  ;;  %v6297_v11 = vld [vmem:[%s6393_s24 + $0x88] sm:$0xf]  ;;  %v2265_v7 = vsel %vm6419_vm4, %v2260_v52, %v2264_v46 }
 0x138   : > { %v2310_v19 = vshll.u32 %v6297_v11, 16  ;;  %v2314_v41 = vshrl.u32 %v6297_v11, 16  ;;  %v2274_v0 = vrot.slane %v2272_v30, 5  ;;  %v2303_v36 = vrot.slane %v2301_v9, 4 }
 0x139   : > { %v2270_v39 = vrot.slane %v2269_v13, 4  ;;  %v2320_v30 = vshll.u32 %v6300_v17, 16  ;;  %v2327_v9 = vrot.slane %v2325_v23, 4  ;;  %v2354_v11 = vrot.slane %v2352_v47, 5 }
 0x13a   : > { %v7958_v24 = vrot.slane %v2310_v19, 5  ;;  %v2316_v49 = vrot.slane %v2314_v41, 4  ;;  %v6251_v19 = vld [vmem:[%s6393_s24 + $0xc0] sm:$0xff]  }
 0x13b   : > { %v2275_v46 = vsel %vm6419_vm4, %v2270_v39, %v2274_v0  ;;  %v5136_v39 = vld [vmem:[%s6393_s24 + $0xa8] sm:$0xf] }
 0x13c   : > { %v2317_v13 = vor.u32 %v2316_v49, %v7958_v24  ;;  %v5153_v41 = vcombine.low %v2265_v7, %v2275_v46  ;;  %v2368_v7 = vshll.u32 %v6302_v25, 16  ;;  %v2376_v45 = vshll.u32 %v5136_v39, 16 }
 0x13d   : > { %5884 = vmatmul.mubr.msk.bf16.gmra.mrb[4].mxu0 %vm689_vm3, %v5420_v61  ;;  %v6298_v61 = vld [vmem:[%s6393_s24 + $0x94] sm:$0xf] }
 0x13e   : > { %5730 = vmatmul.mubr.msk.bf16.gmra.mrb[20].mxu1 %vm689_vm3, %v6247_v51  ;;  %5887 = vmatprep.mubr.msk.bf16.mxu0 %vm689_vm3, %v5421_v10  ;;  %v2306_v10 = vrot.slane %v2304_v18, 5  ;;  %v2334_v51 = vshll.u32 %v6298_v61, 16  ;;  %v2338_v28 = vshrl.u32 %v6298_v61, 16  ;;  %v2318_v0 = vrot.slane %v2317_v13, 4 }
 0x13f   : > { %5733 = vmatprep.mubr.msk.bf16.mxu1 %vm689_vm3, %v6248_v21  ;;  %v2349_v21 = vshrl.u32 %v5133_v35, 16  ;;  %v6301_v35 = vld [vmem:[%s6393_s24 + $0x98] sm:$0x1]  ;;  %v2373_v61 = vshrl.u32 %v5136_v39, 16  ;;  %v5142_v39 = vld [vmem:[%s6393_s24 + $0xc0] sm:$0xf] }
 0x140   : > { %v2307_v15 = vor.u32 %v2306_v10, %v2303_v36  ;;  %v7978_v26 = vrot.slane %v2334_v51, 5  ;;  %v2322_v36 = vrot.slane %v2320_v30, 5  ;;  %v2331_v10 = vor.u32 %v2330_v14, %v2327_v9  ;;  %v5139_v51 = vld [vmem:[%s6393_s24 + $0xb4] sm:$0xf] }
 0x141   : > { %v2351_v18 = vrot.slane %v2349_v21, 4  ;;  %v2386_v21 = vshrl.u32 %v6303_v27, 16  ;;  %v2397_v20 = vshrl.u32 %v5139_v51, 16  ;;  %v2400_v42 = vshll.u32 %v5139_v51, 16 }
 0x142   : > { %v2308_v52 = vrot.slane %v2307_v15, 4  ;;  %v2323_v46 = vsel %vm6419_vm4, %v2318_v0, %v2322_v36  ;;  %v2332_v15 = vrot.slane %v2331_v10, 4  ;;  %v2370_v30 = vrot.slane %v2368_v7, 5 }
 0x143   : > { %v2355_v23 = vor.u32 %v2354_v11, %v2351_v18  ;;  %v2375_v9 = vrot.slane %v2373_v61, 4  ;;  %v2388_v11 = vrot.slane %v2386_v21, 4  ;;  %v6307_v61 = vld [vmem:[%s6393_s24 + $0xbc] sm:$0x1] }
 0x144   : > { %v2313_v47 = vsel %vm6419_vm4, %v2308_v52, %v7958_v24  ;;  %v2337_v0 = vsel %vm6419_vm4, %v2332_v15, %v7978_v26  ;;  %v2416_v22 = vshll.u32 %v6307_v61, 16 }
 0x145   : > { %5888 = vmatmul.mubr.msk.bf16.gmra.mrb[8].mxu0 %vm689_vm3, %v5422_v40  ;;  %v2362_v40 = vshrl.u32 %v6299_v60, 16  ;;  %v2356_v17 = vrot.slane %v2355_v23, 4  ;;  %v5155_v24 = vcombine.low %v2313_v47, %v2323_v46 }
 0x146   : > { %5734 = vmatmul.mubr.msk.bf16.gmra.mrb[24].mxu1 %vm689_vm3, %v6249_v2  ;;  %5891 = vmatprep.mubr.msk.bf16.mxu0 %vm689_vm3, %v5423_v54  ;;  %v2340_v54 = vrot.slane %v2338_v28, 4 }
 0x147   : > { %5737 = vmatprep.mubr.msk.bf16.mxu1 %vm689_vm3, %v6250_v34  ;;  %v2364_v2 = vrot.slane %v2362_v40, 4  ;;  %v2344_v34 = vshll.u32 %v6301_v35, 16  ;;  %v2361_v10 = vsel %vm6419_vm4, %v2356_v17, %v7981_v6  ;;  %v2442_v17 = vrot.slane %v2440_v57, 5 }
 0x148   : > { %v2341_v49 = vor.u32 %v2340_v54, %v7978_v26  ;;  %v2378_v54 = vrot.slane %v2376_v45, 5  ;;  %v6305_v26 = vld [vmem:[%s6393_s24 + $0xb0] sm:$0x1] }
 0x149   : > { %v2365_v28 = vor.u32 %v2364_v2, %v7981_v6  ;;  %v2346_v60 = vrot.slane %v2344_v34, 5  ;;  %v2392_v35 = vshll.u32 %v6305_v26, 16  ;;  %v2421_v34 = vshrl.u32 %v5142_v39, 16 }
 0x14a   : > { %v2342_v13 = vrot.slane %v2341_v49, 4  ;;  %v2379_v38 = vor.u32 %v2378_v54, %v2375_v9  ;;  %v2424_v6 = vshll.u32 %v5142_v39, 16  ;;  %v6306_v49 = vld [vmem:[%s6393_s24 + $0xc4] sm:$0xf] }
 0x14b   : > { %v2366_v14 = vrot.slane %v2365_v28, 4  ;;  %v2430_v23 = vshll.u32 %v6306_v49, 16  ;;  %v2434_v25 = vshrl.u32 %v6306_v49, 16  ;;  %v2394_v45 = vrot.slane %v2392_v35, 5 }
 0x14c   : > { %v2347_v36 = vsel %vm6419_vm4, %v2342_v13, %v2346_v60  ;;  %v2380_v51 = vrot.slane %v2379_v38, 4  ;;  %v2418_v60 = vrot.slane %v2416_v22, 5 }
 0x14d   : > { %5892 = vmatmul.mubr.msk.bf16.gmra.mrb[12].mxu0 %vm689_vm3, %v5424_v53  ;;  %v2382_v53 = vshll.u32 %v6303_v27, 16  ;;  %v2371_v59 = vsel %vm6419_vm4, %v2366_v14, %v2370_v30  ;;  %v5156_v44 = vcombine.low %v2337_v0, %v2347_v36  ;;  %v2423_v27 = vrot.slane %v2421_v34, 4 }
 0x14e   : > { %5738 = vmatmul.mubr.msk.bf16.gmra.mrb[28].mxu1 %vm689_vm3, %v6251_v19  ;;  %5895 = vmatprep.mubr.msk.bf16.mxu0 %vm689_vm3, %v5425_v33  ;;  %v6304_v33 = vld [vmem:[%s6393_s24 + $0xb8] sm:$0xf]  ;;  %v2399_v19 = vrot.slane %v2397_v20, 4  ;;  %v2432_v21 = vrot.slane %v2430_v23, 5  ;;  %v2436_v47 = vrot.slane %v2434_v25, 4 }
 0x14f   : > { %5759 = vmatprep.mubr.msk.bf16.mxu1 %vm689_vm3, %v5153_v41  ;;  %v2406_v12 = vshll.u32 %v6304_v33, 16  ;;  %v2410_v40 = vshrl.u32 %v6304_v33, 16  ;;  %v2384_v18 = vrot.slane %v2382_v53, 5  ;;  %v2402_v41 = vrot.slane %v2400_v42, 5 }
 0x150   : > { %v2426_v53 = vrot.slane %v2424_v6, 5 }
 0x151   : > { %v2408_v52 = vrot.slane %v2406_v12, 5  ;;  %v2412_v2 = vrot.slane %v2410_v40, 4  ;;  %v2385_v20 = vsel %vm6419_vm4, %v2380_v51, %v2384_v18  ;;  %v2437_v12 = vor.u32 %v2436_v47, %v2432_v21 }
 0x152   : > { %v2427_v33 = vor.u32 %v2426_v53, %v2423_v27 }
 0x153   : > { %v2413_v7 = vor.u32 %v2412_v2, %v2408_v52  ;;  %v2438_v13 = vrot.slane %v2437_v12, 4 }
 0x154   : > { %v2428_v40 = vrot.slane %v2427_v33, 4 }
 0x155   : > { %5896 = vmatmul.mubr.msk.bf16.gmra.mrb[16].mxu0 %vm689_vm3, %v5426_v37  ;;  %v2389_v37 = vor.u32 %v2388_v11, %v2384_v18  ;;  %v2414_v15 = vrot.slane %v2413_v7, 4  ;;  %v2443_v9 = vsel %vm6419_vm4, %v2438_v13, %v2442_v17 }
 0x156   : > { %5760 = vmatmul.mubr.msk.bf16.vlgmr.msra.gmra.mrb[16].mxu1 %vm689_vm3, %v7787_v1  ;;  %5899 = vmatprep.mubr.msk.bf16.mxu0 %vm689_vm3, %v5427_v3  ;;  %v2403_v1 = vor.u32 %v2402_v41, %v2399_v19  ;;  %v5157_v3 = vcombine.low %v2361_v10, %v2371_v59  ;;  %v2433_v30 = vsel %vm6419_vm4, %v2428_v40, %v2432_v21 }
 0x157   : > { %5763 = vmatprep.mubr.msk.bf16.mxu1 %vm689_vm3, %v5155_v24  ;;  %v2390_v28 = vrot.slane %v2389_v37, 4  ;;  %v2419_v48 = vsel %vm6419_vm4, %v2414_v15, %v2418_v60  ;;  %v5160_v14 = vcombine.low %v2433_v30, %v2443_v9 }
 0x158   : > { %v2404_v46 = vrot.slane %v2403_v1, 4 }
 0x159   : > { %v2395_v42 = vsel %vm6419_vm4, %v2390_v28, %v2394_v45 }
 0x15a   : > { %v5158_v62 = vcombine.low %v2385_v20, %v2395_v42 }
 0x15d   : > { %5900 = vmatmul.mubr.msk.bf16.gmra.mrb[20].mxu0 %vm689_vm3, %v5428_v8  ;;  %v2409_v8 = vsel %vm6419_vm4, %v2404_v46, %v2408_v52 }
 0x15e   : > { %5764 = vmatmul.mubr.msk.bf16.gmra.mrb[20].mxu1 %vm689_vm3, %v5156_v44  ;;  %5903 = vmatprep.mubr.msk.bf16.mxu0 %vm689_vm3, %v5429_v56  ;;  %v5159_v56 = vcombine.low %v2409_v8, %v2419_v48 }
 0x15f   : > { %5767 = vmatprep.mubr.msk.bf16.mxu1 %vm689_vm3, %v5157_v3 }
 0x165   : > { %5904 = vmatmul.mubr.msk.bf16.gmra.mrb[24].mxu0 %vm689_vm3, %v5430_v43 }
 0x166   : > { %5768 = vmatmul.mubr.msk.bf16.gmra.mrb[24].mxu1 %vm689_vm3, %v5158_v62  ;;  %5907 = vmatprep.mubr.msk.bf16.mxu0 %vm689_vm3, %v5431_v50 }
 0x167   : > { %5771 = vmatprep.mubr.msk.bf16.mxu1 %vm689_vm3, %v5159_v56 }
 0x16d   : > { %5908 = vmatmul.mubr.msk.bf16.gmra.mrb[28].mxu0 %vm689_vm3, %v5432_v29 }
 0x16e   : > { %5772 = vmatmul.mubr.msk.bf16.gmra.mrb[28].mxu1 %vm689_vm3, %v5160_v14 }
 0x1e9   : > { %v5711_v63 = vpop.f32.mrb[0].mxu1 }
 0x1ea   : > { %v1853_v4 = vpop.f32.mrb[1].mxu1 }
 0x1eb   : > { %v5712_v43 = vpop.f32.mrb[2].mxu1 }
 0x1ec   : > { %v1856_v16 = vpop.f32.mrb[3].mxu1 }
 0x1f1   : > { %v5715_v58 = vpop.f32.mrb[4].mxu1 }
 0x1f2   : > { %v1869_v50 = vpop.f32.mrb[5].mxu1 }
 0x1f3   : > { %v5716_v54 = vpop.f32.mrb[6].mxu1 }
 0x1f4   : > { %v1872_v18 = vpop.f32.mrb[7].mxu1 }
 0x1f9   : > { %v5719_v11 = vpop.f32.mrb[8].mxu1 }
 0x1fa   : > { %v1885_v32 = vpop.f32.mrb[9].mxu1 }
 0x1fb   : > { %v5720_v24 = vpop.f32.mrb[10].mxu1 }
 0x1fc   : > { %v1888_v19 = vpop.f32.mrb[11].mxu1 }
 0x201   : > { %v5723_v41 = vpop.f32.mrb[12].mxu1 }
 0x202   : > { %v1901_v52 = vpop.f32.mrb[13].mxu1 }
 0x203   : > { %v5724_v5 = vpop.f32.mrb[14].mxu1 }
 0x204   : > { %v1904_v55 = vpop.f32.mrb[15].mxu1 }
 0x208   : > { %v5881_v29 = vpop.f32.mrb[0].mxu0 }
 0x209   : > { %v5913_v2 = vadd.f32 %v5881_v29, %v5711_v63  ;;  %v4602_v39 = vpop.f32.mrb[1].mxu0 }
 0x20a   : > { %v5914_v0 = vadd.f32 %v4602_v39, %v1853_v4  ;;  %v5882_v36 = vpop.f32.mrb[2].mxu0 }
 0x20b   : > { %4763 = vst [vmem:[%s8073_s18 + $0x10] sm:$0xff] %v5913_v2  ;;  %v5915_v10 = vadd.f32 %v5882_v36, %v5712_v43  ;;  %v4605_v59 = vpop.f32.mrb[3].mxu0 }
 0x20c   : > { %4761 = vst [vmem:[%s8073_s18] sm:$0xff] %v5914_v0  ;;  %v5916_v38 = vadd.f32 %v4605_v59, %v1856_v16 }
 0x20d   : > { %4764 = vst [vmem:[%s8073_s18 + $0x18] sm:$0xff] %v5915_v10 }
 0x20e   : > { %4762 = vst [vmem:[%s8073_s18 + $0x8] sm:$0xff] %v5916_v38 }
 0x210   : > { %v5885_v37 = vpop.f32.mrb[4].mxu0 }
 0x211   : > { %v5917_v26 = vadd.f32 %v5885_v37, %v5715_v58  ;;  %v4618_v35 = vpop.f32.mrb[5].mxu0 }
 0x212   : > { %v5918_v34 = vadd.f32 %v4618_v35, %v1869_v50  ;;  %v5886_v6 = vpop.f32.mrb[6].mxu0 }
 0x213   : > { %4767 = vst [vmem:[%s8073_s18 + $0x30] sm:$0xff] %v5917_v26  ;;  %v5919_v49 = vadd.f32 %v5886_v6, %v5716_v54  ;;  %v4621_v23 = vpop.f32.mrb[7].mxu0 }
 0x214   : > { %4765 = vst [vmem:[%s8073_s18 + $0x20] sm:$0xff] %v5918_v34  ;;  %v5920_v25 = vadd.f32 %v4621_v23, %v1872_v18 }
 0x215   : > { %4768 = vst [vmem:[%s8073_s18 + $0x38] sm:$0xff] %v5919_v49 }
 0x216   : > { %4766 = vst [vmem:[%s8073_s18 + $0x28] sm:$0xff] %v5920_v25 }
 0x218   : > { %v5889_v1 = vpop.f32.mrb[8].mxu0 }
 0x219   : > { %v5921_v7 = vadd.f32 %v5889_v1, %v5719_v11  ;;  %v4634_v61 = vpop.f32.mrb[9].mxu0 }
 0x21a   : > { %v5922_v22 = vadd.f32 %v4634_v61, %v1885_v32  ;;  %v5890_v44 = vpop.f32.mrb[10].mxu0 }
 0x21b   : > { %4771 = vst [vmem:[%s8073_s18 + $0x50] sm:$0xff] %v5921_v7  ;;  %v5923_v3 = vadd.f32 %v5890_v44, %v5720_v24  ;;  %v4637_v51 = vpop.f32.mrb[11].mxu0 }
 0x21c   : > { %4769 = vst [vmem:[%s8073_s18 + $0x40] sm:$0xff] %v5922_v22  ;;  %v5924_v28 = vadd.f32 %v4637_v51, %v1888_v19 }
 0x21d   : > { %4772 = vst [vmem:[%s8073_s18 + $0x58] sm:$0xff] %v5923_v3 }
 0x21e   : > { %4770 = vst [vmem:[%s8073_s18 + $0x48] sm:$0xff] %v5924_v28 }
 0x220   : > { %v5893_v45 = vpop.f32.mrb[12].mxu0 }
 0x221   : > { %v5925_v27 = vadd.f32 %v5893_v45, %v5723_v41  ;;  %v4650_v53 = vpop.f32.mrb[13].mxu0 }
 0x222   : > { %v5926_v21 = vadd.f32 %v4650_v53, %v1901_v52  ;;  %v5894_v47 = vpop.f32.mrb[14].mxu0 }
 0x223   : > { %4775 = vst [vmem:[%s8073_s18 + $0x70] sm:$0xff] %v5925_v27  ;;  %v5927_v46 = vadd.f32 %v5894_v47, %v5724_v5  ;;  %v4653_v15 = vpop.f32.mrb[15].mxu0 }
 0x224   : > { %4773 = vst [vmem:[%s8073_s18 + $0x60] sm:$0xff] %v5926_v21  ;;  %v5928_v60 = vadd.f32 %v4653_v15, %v1904_v55 }
 0x225   : > { %4776 = vst [vmem:[%s8073_s18 + $0x78] sm:$0xff] %v5927_v46 }
 0x226   : > { %4774 = vst [vmem:[%s8073_s18 + $0x68] sm:$0xff] %v5928_v60 }
 0x228   : > { %v5897_v20 = vpop.f32.mrb[16].mxu0 }
 0x229   : > { %v5761_v42 = vpop.f32.mrb[16].mxu1  ;;  %v4666_v33 = vpop.f32.mrb[17].mxu0 }
 0x22a   : > { %v5929_v12 = vadd.f32 %v5897_v20, %v5761_v42  ;;  %v2642_v31 = vpop.f32.mrb[17].mxu1  ;;  %v5898_v57 = vpop.f32.mrb[18].mxu0 }
 0x22b   : > { %v5930_v8 = vadd.f32 %v4666_v33, %v2642_v31  ;;  %v5762_v48 = vpop.f32.mrb[18].mxu1  ;;  %v4669_v62 = vpop.f32.mrb[19].mxu0 }
 0x22c   : > { %4779 = vst [vmem:[%s8073_s18 + $0x90] sm:$0xff] %v5929_v12  ;;  %v5931_v56 = vadd.f32 %v5898_v57, %v5762_v48  ;;  %v2645_v40 = vpop.f32.mrb[19].mxu1 }
 0x22d   : > { %4777 = vst [vmem:[%s8073_s18 + $0x80] sm:$0xff] %v5930_v8  ;;  %v5932_v13 = vadd.f32 %v4669_v62, %v2645_v40 }
 0x22e   : > { %4780 = vst [vmem:[%s8073_s18 + $0x98] sm:$0xff] %v5931_v56 }
 0x22f   : > { %4778 = vst [vmem:[%s8073_s18 + $0x88] sm:$0xff] %v5932_v13 }
 0x230   : > { %v5901_v17 = vpop.f32.mrb[20].mxu0 }
 0x231   : > { %v5765_v30 = vpop.f32.mrb[20].mxu1  ;;  %v4682_v9 = vpop.f32.mrb[21].mxu0 }
 0x232   : > { %v5933_v14 = vadd.f32 %v5901_v17, %v5765_v30  ;;  %v2658_v63 = vpop.f32.mrb[21].mxu1  ;;  %v5902_v4 = vpop.f32.mrb[22].mxu0 }
 0x233   : > { %v5934_v43 = vadd.f32 %v4682_v9, %v2658_v63  ;;  %v5766_v16 = vpop.f32.mrb[22].mxu1  ;;  %v4685_v58 = vpop.f32.mrb[23].mxu0 }
 0x234   : > { %4783 = vst [vmem:[%s8073_s18 + $0xb0] sm:$0xff] %v5933_v14  ;;  %v5935_v50 = vadd.f32 %v5902_v4, %v5766_v16  ;;  %v2661_v54 = vpop.f32.mrb[23].mxu1 }
 0x235   : > { %4781 = vst [vmem:[%s8073_s18 + $0xa0] sm:$0xff] %v5934_v43  ;;  %v5936_v18 = vadd.f32 %v4685_v58, %v2661_v54 }
 0x236   : > { %4784 = vst [vmem:[%s8073_s18 + $0xb8] sm:$0xff] %v5935_v50 }
 0x237   : > { %4782 = vst [vmem:[%s8073_s18 + $0xa8] sm:$0xff] %v5936_v18 }
 0x238   : > { %v5905_v11 = vpop.f32.mrb[24].mxu0 }
 0x239   : > { %v5769_v32 = vpop.f32.mrb[24].mxu1  ;;  %v4698_v24 = vpop.f32.mrb[25].mxu0 }
 0x23a   : > { %v5937_v19 = vadd.f32 %v5905_v11, %v5769_v32  ;;  %v2674_v41 = vpop.f32.mrb[25].mxu1  ;;  %v5906_v52 = vpop.f32.mrb[26].mxu0 }
 0x23b   : > { %v5938_v5 = vadd.f32 %v4698_v24, %v2674_v41  ;;  %v5770_v55 = vpop.f32.mrb[26].mxu1  ;;  %v4701_v29 = vpop.f32.mrb[27].mxu0 }
 0x23c   : > { %4787 = vst [vmem:[%s8073_s18 + $0xd0] sm:$0xff] %v5937_v19  ;;  %v5939_v2 = vadd.f32 %v5906_v52, %v5770_v55  ;;  %v2677_v39 = vpop.f32.mrb[27].mxu1 }
 0x23d   : > { %4785 = vst [vmem:[%s8073_s18 + $0xc0] sm:$0xff] %v5938_v5  ;;  %v5940_v0 = vadd.f32 %v4701_v29, %v2677_v39 }
 0x23e   : > { %4788 = vst [vmem:[%s8073_s18 + $0xd8] sm:$0xff] %v5939_v2 }
 0x23f   : > { %4786 = vst [vmem:[%s8073_s18 + $0xc8] sm:$0xff] %v5940_v0 }
 0x240   : > { %v5909_v36 = vpop.f32.mrb[28].mxu0 }
 0x241   : > { %v5773_v10 = vpop.f32.mrb[28].mxu1  ;;  %v4714_v59 = vpop.f32.mrb[29].mxu0 }
 0x242   : > { %v5941_v38 = vadd.f32 %v5909_v36, %v5773_v10  ;;  %v2690_v37 = vpop.f32.mrb[29].mxu1  ;;  %v5910_v26 = vpop.f32.mrb[30].mxu0 }
 0x243   : > { %v5942_v35 = vadd.f32 %v4714_v59, %v2690_v37  ;;  %v5774_v34 = vpop.f32.mrb[30].mxu1  ;;  %v4717_v6 = vpop.f32.mrb[31].mxu0 }
 0x244   : > { %4791 = vst [vmem:[%s8073_s18 + $0xf0] sm:$0xff] %v5941_v38  ;;  %v5943_v49 = vadd.f32 %v5910_v26, %v5774_v34  ;;  %v2693_v23 = vpop.f32.mrb[31].mxu1 }
 0x245   : > { %4789 = vst [vmem:[%s8073_s18 + $0xe0] sm:$0xff] %v5942_v35  ;;  %v5944_v25 = vadd.f32 %v4717_v6, %v2693_v23 }
 0x246   : > { %4792 = vst [vmem:[%s8073_s18 + $0xf8] sm:$0xff] %v5943_v49 }
 0x247   : > { %4790 = vst [vmem:[%s8073_s18 + $0xe8] sm:$0xff] %v5944_v25 }
 0x248 PF: > { %s12_s11 = sadd.s32 1, %s6331_s11   ;;  %s8186_s9 = smov %s6327_s10 }
 0x249   : > { %p9_p5 = scmp.ge.s32.totalorder %s12_s11, 4   ;;  %s8187_s10 = smov %s8189_s12 }
 0x24b   :  { %11 = sbr.rel (!%p9_p5) target bundleno = 2 (0x2), region = 64 }

</bundles_post_ra>
